<compile_context>
chip_gen: v5e
topology: v5e:2x2
jax: 0.10.0
libtpu: 0.0.40
codegen_flags: <defaults>
</compile_context>

<pallas_src>
import jax
import jax.numpy as jnp
from jax.experimental import pallas as pl
from jax.experimental.pallas import tpu as pltpu

# ----- "hyp" constants (deterministic, in-script) ---------------------------
NUM_SAMPLES = 64          # hyp.moc3D_num_samples
MOC3D_COEFF = 1.0         # hyp.moc3D_coeff
TEMP = 0.07               # MoCo temperature
QUEUE_K = 512             # MoCo dictionary (queue) size


def _moc_kernel(ptr_ref, q_ref, k_ref, queue_ref, loss_ref, queue_out_ref):
    """Fused MoCo InfoNCE loss + FIFO ring-buffer enqueue (single resident pass).

    ptr_ref:       SMEM (1,)   int32  ring-buffer write pointer
    q_ref:         VMEM (N, C) f32    query embeddings (emb0_vec)
    k_ref:         VMEM (N, C) f32    key embeddings   (emb1_vec, detached)
    queue_ref:     VMEM (K, C) f32    negative-key dictionary (pre-update)
    loss_ref:      VMEM (1, 1) f32    coeff-scaled loss
    queue_out_ref: VMEM (K, C) f32    updated dictionary (HBM-aliased with queue_ref)
    """
    n = q_ref.shape[0]
    inv_t = jnp.float32(1.0 / TEMP)

    q = q_ref[...]
    k = k_ref[...]
    # L2-normalize rows to match the unit-norm MoCo dictionary.
    q = q * jax.lax.rsqrt(jnp.sum(q * q, axis=-1, keepdims=True) + 1e-12)
    k = k * jax.lax.rsqrt(jnp.sum(k * k, axis=-1, keepdims=True) + 1e-12)
    # Fold the temperature into q once ((N, C) multiply instead of (N, K)).
    q = q * inv_t

    # Positive logit per row: <q, k> / T  -> (N, 1), f32 on the VPU.
    pos = jnp.sum(q * k, axis=-1, keepdims=True)

    # Negative logits: q @ queue^T -> (N, K); bf16 operands, f32 accumulation.
    queue = queue_ref[...]
    l_neg = jax.lax.dot_general(
        q.astype(jnp.bfloat16), queue.astype(jnp.bfloat16),
        dimension_numbers=(((1,), (1,)), ((), ())),
        preferred_element_type=jnp.float32)

    # Cross-entropy with label 0: loss_i = logsumexp([pos, l_neg_i]) - pos.
    # No max-shift: all logits are bounded by 1/T after L2 normalization, so
    # exp is safe in f32.
    lse = jnp.log(jnp.exp(pos) + jnp.sum(jnp.exp(l_neg), axis=-1, keepdims=True))
    loss_ref[...] = (jnp.mean(lse - pos) * MOC3D_COEFF).reshape(1, 1)

    # enqueue(emb1_vec): FIFO ring write of the (already normalized) keys at
    # the SMEM-held pointer.  ptr is always a multiple of N (QUEUE_K % N == 0),
    # so the dynamic-sublane store is tile-aligned.
    ptr = pl.multiple_of(ptr_ref[0], n)
    queue_out_ref[...] = queue                       # carry unmodified entries
    queue_out_ref[pl.ds(ptr, n), :] = k.astype(queue_out_ref.dtype)


def moc_loss_and_enqueue(emb0_vec, emb1_vec, queue, queue_ptr):
    """Returns (scaled InfoNCE loss, updated queue).  queue is (K, C)."""
    n, c = emb0_vec.shape
    kk, cq = queue.shape
    assert cq == c and kk % n == 0 and n % 8 == 0
    ptr_arr = jnp.reshape(queue_ptr.astype(jnp.int32), (1,))

    loss, new_queue = pl.pallas_call(
        _moc_kernel,
        out_shape=(
            jax.ShapeDtypeStruct((1, 1), jnp.float32),
            jax.ShapeDtypeStruct((kk, c), queue.dtype),
        ),
        in_specs=[
            pl.BlockSpec(memory_space=pltpu.MemorySpace.SMEM),   # queue_ptr
            pl.BlockSpec(memory_space=pltpu.MemorySpace.VMEM),   # q (N, C)
            pl.BlockSpec(memory_space=pltpu.MemorySpace.VMEM),   # k (N, C)
            pl.BlockSpec(memory_space=pltpu.MemorySpace.VMEM),   # queue (K, C)
        ],
        out_specs=(
            pl.BlockSpec(memory_space=pltpu.MemorySpace.VMEM),   # loss (1, 1)
            pl.BlockSpec(memory_space=pltpu.MemorySpace.VMEM),   # new queue
        ),
        input_output_aliases={3: 1},   # queue -> new_queue (in-place ring)
        # Working set (q + k + queue + l_neg) ~= 0.6 MiB: far below the scoped
        # VMEM default on v5e/v6e/v7x, so no vmem_limit_bytes or K-tiling here.
        # TODO(synk): at real MoCo sizes (K = 16K-65K) re-tile K with an
        # online-LSE accumulator (mandatory on v7x, 64 MiB VMEM) or raise
        # vmem_limit_bytes on v6e; keep the queue in HBM (pl.ANY) and DMA only
        # the ring slot back instead of the full-block writeback.
    )(ptr_arr, emb0_vec, emb1_vec, queue)
    return loss[0, 0], new_queue


def _mocnet3d_forward(emb0, emb1, valid0, valid1, queue, queue_ptr, key):
    """Returns (total_loss, new_queue, new_queue_ptr)."""
    B, C, Z, Y, X = emb0.shape
    S = Z * Y * X
    n_samp = NUM_SAMPLES * B
    assert n_samp < B * S

    # TODO(synk): torch.isnan(...).any() assert and summ_writer logging / PCA
    # visualization have no effect on the returned loss; omitted.
    # valid0 * valid1 is sampled and discarded in the reference module, so it
    # does not enter the loss; dropped here (same semantics).
    del valid0, valid1

    perm = jax.random.permutation(key, B * S)        # torch.randperm equivalent
    idx = perm[:n_samp]
    b_idx = idx // S
    s_idx = idx % S

    # Gather the sampled rows straight from the channel-first (B, C, S) view;
    # no full channel-last transposed copy of emb0/emb1 is materialized.
    # TODO(synk): for large voxel grids, fuse this gather into the kernel as a
    # scalar-prefetch-driven per-row HBM->VMEM DMA gather so only n_samp rows
    # ever leave HBM; kept as an XLA gather here for lowering robustness
    # (the strided per-sample DMA needs dynamic minor-dim offsets).
    emb0_vec = emb0.reshape(B, C, S)[b_idx, :, s_idx]    # (n_samp, C)
    emb1_vec = emb1.reshape(B, C, S)[b_idx, :, s_idx]
    emb1_vec = jax.lax.stop_gradient(emb1_vec)           # .detach()
    # TODO(synk): pallas_call is not differentiable; training the query encoder
    # through this loss needs a jax.custom_vjp with a backward kernel.

    total_loss, new_queue = moc_loss_and_enqueue(emb0_vec, emb1_vec, queue,
                                                 queue_ptr)
    new_ptr = jnp.mod(queue_ptr.astype(jnp.int32) + n_samp, QUEUE_K)
    return total_loss, new_queue, new_ptr


# Donate the queue so the in-kernel aliased ring update is truly in place.
mocnet3d_forward = jax.jit(_mocnet3d_forward, donate_argnums=(4,))


if __name__ == "__main__":
    # Small shapes consistent with the module: (B, C, Z, Y, X)
    B, C, Z, Y, X = 2, 32, 8, 8, 8
    key = jax.random.PRNGKey(0)
    k0, k1, kq, kperm = jax.random.split(key, 4)

    emb0 = jax.random.normal(k0, (B, C, Z, Y, X), dtype=jnp.float32)
    emb1 = jax.random.normal(k1, (B, C, Z, Y, X), dtype=jnp.float32)
    valid0 = jnp.ones((B, 1, Z, Y, X), dtype=jnp.float32)
    valid1 = jnp.ones((B, 1, Z, Y, X), dtype=jnp.float32)

    # moc_trainer dictionary state in its natural (K, C) row layout (unit-norm
    # keys), plus the FIFO write pointer.
    queue = jax.random.normal(kq, (QUEUE_K, C), dtype=jnp.float32)
    queue = queue / jnp.linalg.norm(queue, axis=-1, keepdims=True)
    queue_ptr = jnp.int32(0)

    total_loss, new_queue, new_ptr = mocnet3d_forward(
        emb0, emb1, valid0, valid1, queue, queue_ptr, kperm)
    jax.block_until_ready((total_loss, new_queue, new_ptr))
    assert jnp.isfinite(total_loss)
    print("KERNEL_OK")
</pallas_src>

<mosaic_0001>
module attributes {stable_mosaic.version = 11 : i64} {
  func.func @_moc_kernel(%arg0: memref<1xi32, #tpu.memory_space<smem>>, %arg1: memref<128x32xf32, #tpu.memory_space<vmem>>, %arg2: memref<128x32xf32, #tpu.memory_space<vmem>>, %arg3: memref<512x32xf32, #tpu.memory_space<vmem>>, %arg4: memref<1x1xf32, #tpu.memory_space<vmem>>, %arg5: memref<512x32xf32, #tpu.memory_space<vmem>>) attributes {dimension_semantics = [], scalar_prefetch = 0 : i64, scratch_operands = 0 : i64, tpu.core_type = #tpu.core_type<tc>} {
    %c0 = arith.constant 0 : index
    %c0_0 = arith.constant 0 : index
    %0 = vector.load %arg1[%c0, %c0_0] : memref<128x32xf32, #tpu.memory_space<vmem>>, vector<128x32xf32>
    %c0_1 = arith.constant 0 : index
    %c0_2 = arith.constant 0 : index
    %1 = vector.load %arg2[%c0_1, %c0_2] : memref<128x32xf32, #tpu.memory_space<vmem>>, vector<128x32xf32>
    %2 = arith.mulf %0, %0 : vector<128x32xf32>
    %cst = arith.constant dense<0.000000e+00> : vector<128xf32>
    %3 = vector.multi_reduction <add>, %2, %cst [1] : vector<128x32xf32> to vector<128xf32>
    %4 = vector.shape_cast %3 : vector<128xf32> to vector<128x1xf32>
    %cst_3 = arith.constant 9.99999996E-13 : f32
    %5 = vector.broadcast %cst_3 : f32 to vector<128x1xf32>
    %6 = arith.addf %4, %5 : vector<128x1xf32>
    %7 = math.rsqrt %6 : vector<128x1xf32>
    %8 = vector.broadcast %7 : vector<128x1xf32> to vector<128x32xf32>
    %9 = arith.mulf %0, %8 : vector<128x32xf32>
    %10 = arith.mulf %1, %1 : vector<128x32xf32>
    %cst_4 = arith.constant dense<0.000000e+00> : vector<128xf32>
    %11 = vector.multi_reduction <add>, %10, %cst_4 [1] : vector<128x32xf32> to vector<128xf32>
    %12 = vector.shape_cast %11 : vector<128xf32> to vector<128x1xf32>
    %cst_5 = arith.constant 9.99999996E-13 : f32
    %13 = vector.broadcast %cst_5 : f32 to vector<128x1xf32>
    %14 = arith.addf %12, %13 : vector<128x1xf32>
    %15 = math.rsqrt %14 : vector<128x1xf32>
    %16 = vector.broadcast %15 : vector<128x1xf32> to vector<128x32xf32>
    %17 = arith.mulf %1, %16 : vector<128x32xf32>
    %cst_6 = arith.constant 14.2857141 : f32
    %18 = vector.broadcast %cst_6 : f32 to vector<128x32xf32>
    %19 = arith.mulf %9, %18 : vector<128x32xf32>
    %20 = arith.mulf %19, %17 : vector<128x32xf32>
    %cst_7 = arith.constant dense<0.000000e+00> : vector<128xf32>
    %21 = vector.multi_reduction <add>, %20, %cst_7 [1] : vector<128x32xf32> to vector<128xf32>
    %22 = vector.shape_cast %21 : vector<128xf32> to vector<128x1xf32>
    %c0_8 = arith.constant 0 : index
    %c0_9 = arith.constant 0 : index
    %23 = vector.load %arg3[%c0_8, %c0_9] : memref<512x32xf32, #tpu.memory_space<vmem>>, vector<512x32xf32>
    %24 = arith.truncf %19 : vector<128x32xf32> to vector<128x32xbf16>
    %25 = arith.truncf %23 : vector<512x32xf32> to vector<512x32xbf16>
    %cst_10 = arith.constant dense<0.000000e+00> : vector<128x512xf32>
    %26 = tpu.matmul %24, %25, %cst_10 {dimension_numbers = #tpu.dot_dimension_numbers<[1], [1], [0], [0], [0, 0, 1, 0], [], []>} : vector<128x32xbf16>, vector<512x32xbf16>, vector<128x512xf32> -> vector<128x512xf32>
    %27 = math.exp %22 : vector<128x1xf32>
    %28 = math.exp %26 : vector<128x512xf32>
    %cst_11 = arith.constant dense<0.000000e+00> : vector<128xf32>
    %29 = vector.multi_reduction <add>, %28, %cst_11 [1] : vector<128x512xf32> to vector<128xf32>
    %30 = vector.shape_cast %29 : vector<128xf32> to vector<128x1xf32>
    %31 = arith.addf %27, %30 : vector<128x1xf32>
    %32 = math.log %31 : vector<128x1xf32>
    %33 = arith.subf %32, %22 : vector<128x1xf32>
    %34 = vector.shape_cast %33 : vector<128x1xf32> to vector<1x128x1xf32>
    %cst_12 = arith.constant dense<0.000000e+00> : vector<1xf32>
    %35 = vector.multi_reduction <add>, %34, %cst_12 [1, 2] : vector<1x128x1xf32> to vector<1xf32>
    %36 = vector.shape_cast %35 : vector<1xf32> to vector<1x1x1xf32>
    %37 = vector.extract %36[0, 0, 0] : f32 from vector<1x1x1xf32>
    %cst_13 = arith.constant 1.280000e+02 : f32
    %38 = arith.divf %37, %cst_13 : f32
    %cst_14 = arith.constant 1.000000e+00 : f32
    %39 = arith.mulf %38, %cst_14 : f32
    %40 = vector.broadcast %39 : f32 to vector<1x1xf32>
    %c0_15 = arith.constant 0 : index
    %c0_16 = arith.constant 0 : index
    %41 = vector.load %arg4[%c0_15, %c0_16] : memref<1x1xf32, #tpu.memory_space<vmem>>, vector<1x1xf32>
    tpu.vector_store %arg4[%c0_15, %c0_16], %40 {strides = array<i32>} : memref<1x1xf32, #tpu.memory_space<vmem>>, vector<1x1xf32>,
    %c0_17 = arith.constant 0 : index
    %42 = memref.load %arg0[%c0_17] : memref<1xi32, #tpu.memory_space<smem>>
    %43 = tpu.assume_multiple %42, 128 : i32
    %c0_18 = arith.constant 0 : index
    %c0_19 = arith.constant 0 : index
    %44 = vector.load %arg5[%c0_18, %c0_19] : memref<512x32xf32, #tpu.memory_space<vmem>>, vector<512x32xf32>
    tpu.vector_store %arg5[%c0_18, %c0_19], %23 {strides = array<i32>} : memref<512x32xf32, #tpu.memory_space<vmem>>, vector<512x32xf32>,
    %45 = arith.index_cast %43 : i32 to index
    %c0_20 = arith.constant 0 : index
    %46 = vector.load %arg5[%45, %c0_20] : memref<512x32xf32, #tpu.memory_space<vmem>>, vector<128x32xf32>
    tpu.vector_store %arg5[%45, %c0_20], %17 {strides = array<i32>} : memref<512x32xf32, #tpu.memory_space<vmem>>, vector<128x32xf32>,
    return
  }
}

</mosaic_0001>

<bundles_post_ra>
// kernel: _mocnet3d_forward.1
= control target key start
LH: loop header
LB: loop body
LE: loop exit
PB: predicated region body
PF: predicated region fallthrough
CT: control target
= control target key end

     0   :  { %vm69_vm0 = vcmask 261120   ;;  %s3551_s0 = inlined_call_operand.<no memory space> [shape: s32[1], index: 0, kind: input, shape index: {}]   ;;  %s3552_s1 = inlined_call_operand.vmem [shape: f32[128,32], index: 1, kind: input, shape index: {}]   ;;  %s3553_s2 = inlined_call_operand.vmem [shape: f32[128,32], index: 2, kind: input, shape index: {}]   ;;  %s3554_s3 = inlined_call_operand.vmem [shape: f32[512,32], index: 3, kind: input, shape index: {}, may-alias: {3,5}]   ;;  %s3555_s4 = inlined_call_operand.hbm [shape: f32[1,1], index: 4, kind: output, shape index: {0}]   ;;  %s3556_s5 = inlined_call_operand.vmem [shape: f32[512,32], index: 5, kind: output, shape index: {1}, may-alias: {3,5}]  }
   0x1   :  { %v1909_v0 = vld [vmem:[%s3552_s1 + $0x20] sm:$0xff]  ;;  %v1914_v1 = vld [vmem:[%s3552_s1 + $0x10] sm:$0xff]  ;;  %v1930_v6 = vld [vmem:[%s3552_s1 + $0x28] sm:$0xff] }
   0x2   :  { %v1919_v2 = vld [vmem:[%s3552_s1] sm:$0xff]  ;;  %v57_v3 = vmul.f32 %v1909_v0, %v1909_v0  ;;  %v55_v4 = vmul.f32 %v1914_v1, %v1914_v1  ;;  %v1935_v7 = vld [vmem:[%s3552_s1 + $0x18] sm:$0xff]  ;;  %v1943_v11 = vld [vmem:[%s3552_s1 + $0x8] sm:$0xff]  ;;  %v58_v12 = vmul.f32 %v1930_v6, %v1930_v6 }
   0x3   :  { %v53_v5 = vmul.f32 %v1919_v2, %v1919_v2  ;;  %v56_v13 = vmul.f32 %v1935_v7, %v1935_v7 }
   0x4   :  { %v82_v8 = vsel %vm69_vm0, %v57_v3, 0.0  ;;  %v76_v9 = vsel %vm69_vm0, %v55_v4, 0.0 }
   0x5   :  { %v70_v10 = vsel %vm69_vm0, %v53_v5, 0.0  ;;  %83 = vadd.xlane.f32.xlu2 %v82_v8  ;;  %77 = vadd.xlane.f32.xlu1 %v76_v9 }
   0x6   :  { %71 = vadd.xlane.f32.xlu0 %v70_v10 }
   0x7   :  { %12 = vsyncpa [#allocation4], 0  ;;  %v54_v14 = vmul.f32 %v1943_v11, %v1943_v11  ;;  %v85_v15 = vsel %vm69_vm0, %v58_v12, 0.0  ;;  %v79_v16 = vsel %vm69_vm0, %v56_v13, 0.0  ;;  %v29_v18 = vld [vmem:[%s3552_s1 + $0x40] sm:$0xff]  ;;  %v28_v19 = vld [vmem:[%s3552_s1 + $0x38] sm:$0xff]  ;;  %s2937_s20 = scalar_lea.vmem %s3556_s5, %s3551_s0 }
   0x8   :  { %v27_v20 = vld [vmem:[%s3552_s1 + $0x30] sm:$0xff]  ;;  %v61_v21 = vmul.f32 %v29_v18, %v29_v18  ;;  %v60_v22 = vmul.f32 %v28_v19, %v28_v19  ;;  %v32_v27 = vld [vmem:[%s3552_s1 + $0x58] sm:$0xff]  ;;  %v30_v29 = vld [vmem:[%s3552_s1 + $0x48] sm:$0xff]  ;;  %s1512_s13 = sshll.u32 %s3555_s4, 4  ;;  %s1875_s15 = smov [#allocation3]   ;;  %s1513_s13 = int_to_ptr.hbm [resolvable:$true] %s1512_s13 }
   0x9   :  { %v73_v17 = vsel %vm69_vm0, %v54_v14, 0.0  ;;  %v59_v23 = vmul.f32 %v27_v20, %v27_v20  ;;  %v31_v28 = vld [vmem:[%s3552_s1 + $0x50] sm:$0xff]  ;;  %v64_v30 = vmul.f32 %v32_v27, %v32_v27  ;;  %v62_v32 = vmul.f32 %v30_v29, %v30_v29  ;;  %v34_v37 = vld [vmem:[%s3552_s1 + $0x68] sm:$0xff]  ;;  %v33_v38 = vld [vmem:[%s3552_s1 + $0x60] sm:$0xff]  ;;  %s1510_s16 = sshll.u32 %s1875_s15, 4  ;;  %s1511_s16 = int_to_ptr.vmem [resolvable:$true] %s1510_s16 }
   0xa   :  { %v94_v24 = vsel %vm69_vm0, %v61_v21, 0.0  ;;  %v91_v25 = vsel %vm69_vm0, %v60_v22, 0.0  ;;  %v63_v31 = vmul.f32 %v31_v28, %v31_v28  ;;  %v35_v36 = vld [vmem:[%s3552_s1 + $0x70] sm:$0xff]  ;;  %v66_v40 = vmul.f32 %v34_v37, %v34_v37  ;;  %v38_v45 = vld [vmem:[%s3553_s2 + $0x8] sm:$0xff]  ;;  %v37_v46 = vld [vmem:[%s3553_s2] sm:$0xff] }
   0xb   :  { %v88_v26 = vsel %vm69_vm0, %v59_v23, 0.0  ;;  %v103_v33 = vsel %vm69_vm0, %v64_v30, 0.0  ;;  %v97_v35 = vsel %vm69_vm0, %v62_v32, 0.0  ;;  %v67_v39 = vmul.f32 %v35_v36, %v35_v36  ;;  %v36_v47 = vld [vmem:[%s3552_s1 + $0x78] sm:$0xff]  ;;  %v41_v51 = vld [vmem:[%s3553_s2 + $0x20] sm:$0xff]  ;;  %v39_v57 = vld [vmem:[%s3553_s2 + $0x10] sm:$0xff] }
   0xc   :  { %v100_v34 = vsel %vm69_vm0, %v63_v31, 0.0  ;;  %v65_v41 = vmul.f32 %v33_v38, %v33_v38  ;;  %v109_v43 = vsel %vm69_vm0, %v66_v40, 0.0  ;;  %v311_v48 = vmul.f32 %v38_v45, %v38_v45  ;;  %v40_v54 = vld [vmem:[%s3553_s2 + $0x18] sm:$0xff]  ;;  %v660_v59 = vld [vmem:[%s3554_s3 + $0x70] sm:$0xff]  ;;  %v42_v32 = vld [vmem:[%s3553_s2 + $0x28] sm:$0xff] }
   0xd   :  { %86 = vadd.xlane.f32.xlu2 %v85_v15  ;;  %80 = vadd.xlane.f32.xlu1 %v79_v16  ;;  %v112_v42 = vsel %vm69_vm0, %v67_v39, 0.0  ;;  %v310_v49 = vmul.f32 %v37_v46, %v37_v46  ;;  %v68_v50 = vmul.f32 %v36_v47, %v36_v47  ;;  %v314_v56 = vmul.f32 %v41_v51, %v41_v51  ;;  %v661_v60 = vld [vmem:[%s3554_s3 + $0x78] sm:$0xff]  ;;  %v676_v61 = vld [vmem:[%s3554_s3 + $0xf0] sm:$0xff] }
   0xe   :  { %74 = vadd.xlane.f32.xlu0 %v73_v17  ;;  %v106_v44 = vsel %vm69_vm0, %v65_v41, 0.0  ;;  %v329_v52 = vsel %vm69_vm0, %v311_v48, 0.0  ;;  %v313_v58 = vmul.f32 %v40_v54, %v40_v54  ;;  %v312_v62 = vmul.f32 %v39_v57, %v39_v57  ;;  %1438 = vst.msk [vmem:[%s3556_s5 + $0x70] sm:$0xff] %vm69_vm0, %v660_v59  ;;  %v44_v15 = vld [vmem:[%s3553_s2 + $0x38] sm:$0xff]  ;;  %v43_v16 = vld [vmem:[%s3553_s2 + $0x30] sm:$0xff]  ;;  %v46_v54 = vld [vmem:[%s3553_s2 + $0x48] sm:$0xff] }
   0xf   :  { %v326_v53 = vsel %vm69_vm0, %v310_v49, 0.0  ;;  %v115_v55 = vsel %vm69_vm0, %v68_v50, 0.0  ;;  %v725_v63 = vpack.c.bf16 %v661_v60, %v660_v59  ;;  %v338_v8 = vsel %vm69_vm0, %v314_v56, 0.0  ;;  %v45_v57 = vld [vmem:[%s3553_s2 + $0x40] sm:$0xff] }
  0x10   :  { %v335_v14 = vsel %vm69_vm0, %v313_v58, 0.0  ;;  %v317_v36 = vmul.f32 %v44_v15, %v44_v15  ;;  %v316_v37 = vmul.f32 %v43_v16, %v43_v16  ;;  %v315_v38 = vmul.f32 %v42_v32, %v42_v32 }
  0x11   :  { %v796_v17 = vsel %vm69_vm0, %v725_v63, 0  ;;  %v318_v63 = vmul.f32 %v45_v57, %v45_v57 }
  0x12   :  { %870 = vmatpush.bf16.xpose.msra.mxu0 %v796_v17  ;;  %v347_v49 = vsel %vm69_vm0, %v317_v36, 0.0  ;;  %v344_v50 = vsel %vm69_vm0, %v316_v37, 0.0 }
  0x15   :  { %95 = vadd.xlane.f32.xlu2 %v94_v24  ;;  %92 = vadd.xlane.f32.xlu1 %v91_v25  ;;  %v677_v3 = vld [vmem:[%s3554_s3 + $0xf8] sm:$0xff]  ;;  %v692_v4 = vld [vmem:[%s3554_s3 + $0x170] sm:$0xff] }
  0x16   :  { %89 = vadd.xlane.f32.xlu0 %v88_v26  ;;  %v693_v5 = vld [vmem:[%s3554_s3 + $0x178] sm:$0xff]  ;;  %v733_v9 = vpack.c.bf16 %v677_v3, %v676_v61  ;;  %v332_v26 = vsel %vm69_vm0, %v312_v62, 0.0 }
  0x17   :  { %1439 = vst.msk [vmem:[%s3556_s5 + $0x78] sm:$0xff] %vm69_vm0, %v661_v60  ;;  %v741_v10 = vpack.c.bf16 %v693_v5, %v692_v4 }
  0x18   :  { %v820_v21 = vsel %vm69_vm0, %v733_v9, 0 }
  0x19   :  { %v844_v22 = vsel %vm69_vm0, %v741_v10, 0  ;;  %919 = vmatpush.bf16.xpose.msra.mxu1 %v820_v21  ;;  %v50_v21 = vld [vmem:[%s3553_s2 + $0x68] sm:$0xff] }
  0x1a   :  { %968 = vmatpush.bf16.xpose.msra.mxu2 %v844_v22  ;;  %v49_v22 = vld [vmem:[%s3553_s2 + $0x60] sm:$0xff] }
  0x1d   :  { %104 = vadd.xlane.f32.xlu2 %v103_v33  ;;  %101 = vadd.xlane.f32.xlu1 %v100_v34 }
  0x1e   :  { %98 = vadd.xlane.f32.xlu0 %v97_v35  ;;  %v708_v12 = vld [vmem:[%s3554_s3 + $0x1f0] sm:$0xff]  ;;  %v709_v13 = vld [vmem:[%s3554_s3 + $0x1f8] sm:$0xff] }
  0x1f   :  { %1454 = vst.msk [vmem:[%s3556_s5 + $0xf0] sm:$0xff] %vm69_vm0, %v676_v61  ;;  %v749_v18 = vpack.c.bf16 %v709_v13, %v708_v12  ;;  %v319_v61 = vmul.f32 %v46_v54, %v46_v54 }
  0x21   :  { %v868_v27 = vsel %vm69_vm0, %v749_v18, 0  ;;  %v353_v16 = vsel %vm69_vm0, %v319_v61, 0.0 }
  0x22   :  { %1017 = vmatpush.bf16.xpose.msra.mxu3 %v868_v27 }
  0x25   :  { %113 = vadd.xlane.f32.xlu2 %v112_v42  ;;  %110 = vadd.xlane.f32.xlu1 %v109_v43 }
  0x26   :  { %107 = vadd.xlane.f32.xlu0 %v106_v44  ;;  %v658_v19 = vld [vmem:[%s3554_s3 + $0x60] sm:$0xff]  ;;  %v659_v20 = vld [vmem:[%s3554_s3 + $0x68] sm:$0xff] }
  0x27   :  { %1455 = vst.msk [vmem:[%s3556_s5 + $0xf8] sm:$0xff] %vm69_vm0, %v677_v3  ;;  %v724_v28 = vpack.c.bf16 %v659_v20, %v658_v19 }
  0x29   :  { %v793_v39 = vsel %vm69_vm0, %v724_v28, 0  ;;  %v323_v28 = vmul.f32 %v50_v21, %v50_v21 }
  0x2a   :  { %871 = vmatpush.bf16.xpose.msra.mxu0 %v793_v39  ;;  %v51_v39 = vld [vmem:[%s3553_s2 + $0x70] sm:$0xff] }
  0x2d   :  { %330 = vadd.xlane.f32.xlu2 %v329_v52  ;;  %327 = vadd.xlane.f32.xlu1 %v326_v53  ;;  %v341_v53 = vsel %vm69_vm0, %v315_v38, 0.0  ;;  %v52_v38 = vld [vmem:[%s3553_s2 + $0x78] sm:$0xff] }
  0x2e   :  { %116 = vadd.xlane.f32.xlu0 %v115_v55  ;;  %v674_v23 = vld [vmem:[%s3554_s3 + $0xe0] sm:$0xff]  ;;  %v675_v24 = vld [vmem:[%s3554_s3 + $0xe8] sm:$0xff]  ;;  %v47_v55 = vld [vmem:[%s3553_s2 + $0x50] sm:$0xff] }
  0x2f   :  { %v690_v25 = vld [vmem:[%s3554_s3 + $0x160] sm:$0xff]  ;;  %v732_v33 = vpack.c.bf16 %v675_v24, %v674_v23  ;;  %v320_v62 = vmul.f32 %v47_v55, %v47_v55 }
  0x30   :  { %1470 = vst.msk [vmem:[%s3556_s5 + $0x170] sm:$0xff] %vm69_vm0, %v692_v4 }
  0x31   :  { %v817_v40 = vsel %vm69_vm0, %v732_v33, 0  ;;  %v356_v17 = vsel %vm69_vm0, %v320_v62, 0.0 }
  0x32   :  { %920 = vmatpush.bf16.xpose.msra.mxu1 %v817_v40  ;;  %v325_v40 = vmul.f32 %v52_v38, %v52_v38 }
  0x35   :  { %339 = vadd.xlane.f32.xlu2 %v338_v8  ;;  %336 = vadd.xlane.f32.xlu1 %v335_v14 }
  0x36   :  { %333 = vadd.xlane.f32.xlu0 %v332_v26 }
  0x37   :  { %v691_v29 = vld [vmem:[%s3554_s3 + $0x168] sm:$0xff]  ;;  %v706_v30 = vld [vmem:[%s3554_s3 + $0x1e0] sm:$0xff] }
  0x38   :  { %v707_v31 = vld [vmem:[%s3554_s3 + $0x1e8] sm:$0xff]  ;;  %v740_v34 = vpack.c.bf16 %v691_v29, %v690_v25 }
  0x39   :  { %1471 = vst.msk [vmem:[%s3556_s5 + $0x178] sm:$0xff] %vm69_vm0, %v693_v5  ;;  %v748_v35 = vpack.c.bf16 %v707_v31, %v706_v30 }
  0x3a   :  { %1486 = vst.msk [vmem:[%s3556_s5 + $0x1f0] sm:$0xff] %vm69_vm0, %v708_v12  ;;  %v841_v41 = vsel %vm69_vm0, %v740_v34, 0 }
  0x3b   :  { %1487 = vst.msk [vmem:[%s3556_s5 + $0x1f8] sm:$0xff] %vm69_vm0, %v709_v13  ;;  %v865_v45 = vsel %vm69_vm0, %v748_v35, 0  ;;  %969 = vmatpush.bf16.xpose.msra.mxu2 %v841_v41  ;;  %v365_v35 = vsel %vm69_vm0, %v323_v28, 0.0  ;;  %v324_v41 = vmul.f32 %v51_v39, %v51_v39 }
  0x3c   :  { %1436 = vst.msk [vmem:[%s3556_s5 + $0x60] sm:$0xff] %vm69_vm0, %v658_v19  ;;  %1018 = vmatpush.bf16.xpose.msra.mxu3 %v865_v45 }
  0x3d   :  { %1437 = vst.msk [vmem:[%s3556_s5 + $0x68] sm:$0xff] %vm69_vm0, %v659_v20  ;;  %348 = vadd.xlane.f32.xlu2 %v347_v49  ;;  %345 = vadd.xlane.f32.xlu1 %v344_v50  ;;  %v350_v20 = vsel %vm69_vm0, %v318_v63, 0.0 }
  0x3e   :  { %342 = vadd.xlane.f32.xlu0 %v341_v53 }
  0x44   :  { %v656_v42 = vld [vmem:[%s3554_s3 + $0x50] sm:$0xff]  ;;  %v657_v43 = vld [vmem:[%s3554_s3 + $0x58] sm:$0xff] }
  0x45   :  { %v672_v44 = vld [vmem:[%s3554_s3 + $0xd0] sm:$0xff]  ;;  %v723_v56 = vpack.c.bf16 %v657_v43, %v656_v42  ;;  %354 = vadd.xlane.f32.xlu1 %v353_v16  ;;  %357 = vadd.xlane.f32.xlu2 %v356_v17 }
  0x46   :  { %1452 = vst.msk [vmem:[%s3556_s5 + $0xe0] sm:$0xff] %vm69_vm0, %v674_v23  ;;  %351 = vadd.xlane.f32.xlu0 %v350_v20 }
  0x47   :  { %v790_v3 = vsel %vm69_vm0, %v723_v56, 0 }
  0x48   :  { %872 = vmatpush.bf16.xpose.msra.mxu0 %v790_v3 }
  0x4d   :  { %v673_v46 = vld [vmem:[%s3554_s3 + $0xd8] sm:$0xff]  ;;  %v688_v47 = vld [vmem:[%s3554_s3 + $0x150] sm:$0xff]  ;;  %366 = vadd.xlane.f32.xlu2 %v365_v35 }
  0x4e   :  { %v689_v48 = vld [vmem:[%s3554_s3 + $0x158] sm:$0xff]  ;;  %v731_v58 = vpack.c.bf16 %v673_v46, %v672_v44 }
  0x4f   :  { %1453 = vst.msk [vmem:[%s3556_s5 + $0xe8] sm:$0xff] %vm69_vm0, %v675_v24  ;;  %v739_v59 = vpack.c.bf16 %v689_v48, %v688_v47  ;;  %v48_v24 = vld [vmem:[%s3553_s2 + $0x58] sm:$0xff] }
  0x50   :  { %v814_v4 = vsel %vm69_vm0, %v731_v58, 0 }
  0x51   :  { %v838_v5 = vsel %vm69_vm0, %v739_v59, 0  ;;  %921 = vmatpush.bf16.xpose.msra.mxu1 %v814_v4 }
  0x52   :  { %970 = vmatpush.bf16.xpose.msra.mxu2 %v838_v5 }
  0x56   :  { %v704_v51 = vld [vmem:[%s3554_s3 + $0x1d0] sm:$0xff]  ;;  %v705_v52 = vld [vmem:[%s3554_s3 + $0x1d8] sm:$0xff] }
  0x57   :  { %1468 = vst.msk [vmem:[%s3556_s5 + $0x160] sm:$0xff] %vm69_vm0, %v690_v25  ;;  %v747_v60 = vpack.c.bf16 %v705_v52, %v704_v51 }
  0x58   :  { %1469 = vst.msk [vmem:[%s3556_s5 + $0x168] sm:$0xff] %vm69_vm0, %v691_v29  ;;  %v322_v29 = vmul.f32 %v49_v22, %v49_v22 }
  0x59   :  { %1484 = vst.msk [vmem:[%s3556_s5 + $0x1e0] sm:$0xff] %vm69_vm0, %v706_v30  ;;  %v862_v12 = vsel %vm69_vm0, %v747_v60, 0  ;;  %v321_v30 = vmul.f32 %v48_v24, %v48_v24 }
  0x5a   :  { %1485 = vst.msk [vmem:[%s3556_s5 + $0x1e8] sm:$0xff] %vm69_vm0, %v707_v31  ;;  %1019 = vmatpush.bf16.xpose.msra.mxu3 %v862_v12  ;;  %v362_v36 = vsel %vm69_vm0, %v322_v29, 0.0 }
  0x5b   :  { %1434 = vst.msk [vmem:[%s3556_s5 + $0x50] sm:$0xff] %vm69_vm0, %v656_v42  ;;  %v359_v37 = vsel %vm69_vm0, %v321_v30, 0.0  ;;  %363 = vadd.xlane.f32.xlu1 %v362_v36  ;;  %v371_v42 = vsel %vm69_vm0, %v325_v40, 0.0 }
  0x5c   :  { %1435 = vst.msk [vmem:[%s3556_s5 + $0x58] sm:$0xff] %vm69_vm0, %v657_v43  ;;  %360 = vadd.xlane.f32.xlu0 %v359_v37  ;;  %v368_v43 = vsel %vm69_vm0, %v324_v41, 0.0 }
  0x63   :  { %v654_v8 = vld [vmem:[%s3554_s3 + $0x40] sm:$0xff]  ;;  %v655_v9 = vld [vmem:[%s3554_s3 + $0x48] sm:$0xff]  ;;  %372 = vadd.xlane.f32.xlu1 %v371_v42 }
  0x64   :  { %v670_v10 = vld [vmem:[%s3554_s3 + $0xc0] sm:$0xff]  ;;  %v722_v23 = vpack.c.bf16 %v655_v9, %v654_v8  ;;  %369 = vadd.xlane.f32.xlu0 %v368_v43 }
  0x65   :  { %1450 = vst.msk [vmem:[%s3556_s5 + $0xd0] sm:$0xff] %vm69_vm0, %v672_v44 }
  0x66   :  { %v787_v31 = vsel %vm69_vm0, %v722_v23, 0 }
  0x67   :  { %873 = vmatpush.bf16.xpose.msra.mxu0 %v787_v31 }
  0x6c   :  { %v671_v13 = vld [vmem:[%s3554_s3 + $0xc8] sm:$0xff]  ;;  %v686_v14 = vld [vmem:[%s3554_s3 + $0x140] sm:$0xff] }
  0x6d   :  { %v687_v15 = vld [vmem:[%s3554_s3 + $0x148] sm:$0xff]  ;;  %v730_v25 = vpack.c.bf16 %v671_v13, %v670_v10 }
  0x6e   :  { %1451 = vst.msk [vmem:[%s3556_s5 + $0xd8] sm:$0xff] %vm69_vm0, %v673_v46  ;;  %v738_v26 = vpack.c.bf16 %v687_v15, %v686_v14 }
  0x6f   :  { %v811_v32 = vsel %vm69_vm0, %v730_v25, 0 }
  0x70   :  { %v835_v33 = vsel %vm69_vm0, %v738_v26, 0  ;;  %922 = vmatpush.bf16.xpose.msra.mxu1 %v811_v32 }
  0x71   :  { %971 = vmatpush.bf16.xpose.msra.mxu2 %v835_v33 }
  0x75   :  { %v702_v18 = vld [vmem:[%s3554_s3 + $0x1c0] sm:$0xff]  ;;  %v703_v19 = vld [vmem:[%s3554_s3 + $0x1c8] sm:$0xff] }
  0x76   :  { %1466 = vst.msk [vmem:[%s3556_s5 + $0x150] sm:$0xff] %vm69_vm0, %v688_v47  ;;  %v746_v27 = vpack.c.bf16 %v703_v19, %v702_v18 }
  0x77   :  { %1467 = vst.msk [vmem:[%s3556_s5 + $0x158] sm:$0xff] %vm69_vm0, %v689_v48 }
  0x78   :  { %1482 = vst.msk [vmem:[%s3556_s5 + $0x1d0] sm:$0xff] %vm69_vm0, %v704_v51  ;;  %v859_v34 = vsel %vm69_vm0, %v746_v27, 0 }
  0x79   :  { %1483 = vst.msk [vmem:[%s3556_s5 + $0x1d8] sm:$0xff] %vm69_vm0, %v705_v52  ;;  %1020 = vmatpush.bf16.xpose.msra.mxu3 %v859_v34 }
  0x7a   :  { %1432 = vst.msk [vmem:[%s3556_s5 + $0x40] sm:$0xff] %vm69_vm0, %v654_v8 }
  0x7b   :  { %1433 = vst.msk [vmem:[%s3556_s5 + $0x48] sm:$0xff] %vm69_vm0, %v655_v9 }
  0x7c   :  { %1448 = vst.msk [vmem:[%s3556_s5 + $0xc0] sm:$0xff] %vm69_vm0, %v670_v10 }
  0x7d   :  { %1449 = vst.msk [vmem:[%s3556_s5 + $0xc8] sm:$0xff] %vm69_vm0, %v671_v13 }
  0x7e   :  { %1464 = vst.msk [vmem:[%s3556_s5 + $0x140] sm:$0xff] %vm69_vm0, %v686_v14 }
  0x7f   :  { %1465 = vst.msk [vmem:[%s3556_s5 + $0x148] sm:$0xff] %vm69_vm0, %v687_v15 }
  0x80   :  { %1480 = vst.msk [vmem:[%s3556_s5 + $0x1c0] sm:$0xff] %vm69_vm0, %v702_v18 }
  0x81   :  { %1481 = vst.msk [vmem:[%s3556_s5 + $0x1c8] sm:$0xff] %vm69_vm0, %v703_v19 }
  0x88   :  { %v652_v44 = vld [vmem:[%s3554_s3 + $0x30] sm:$0xff]  ;;  %v653_v45 = vld [vmem:[%s3554_s3 + $0x38] sm:$0xff] }
  0x89   :  { %v668_v46 = vld [vmem:[%s3554_s3 + $0xb0] sm:$0xff]  ;;  %v721_v47 = vpack.c.bf16 %v653_v45, %v652_v44 }
  0x8a   :  { %1430 = vst.msk [vmem:[%s3556_s5 + $0x30] sm:$0xff] %vm69_vm0, %v652_v44 }
  0x8b   :  { %v784_v55 = vsel %vm69_vm0, %v721_v47, 0 }
  0x8c   :  { %874 = vmatpush.bf16.xpose.msra.mxu0 %v784_v55 }
  0x91   :  { %v669_v48 = vld [vmem:[%s3554_s3 + $0xb8] sm:$0xff]  ;;  %v684_v49 = vld [vmem:[%s3554_s3 + $0x130] sm:$0xff] }
  0x92   :  { %v685_v50 = vld [vmem:[%s3554_s3 + $0x138] sm:$0xff]  ;;  %v729_v51 = vpack.c.bf16 %v669_v48, %v668_v46 }
  0x93   :  { %1431 = vst.msk [vmem:[%s3556_s5 + $0x38] sm:$0xff] %vm69_vm0, %v653_v45  ;;  %v737_v52 = vpack.c.bf16 %v685_v50, %v684_v49 }
  0x94   :  { %v808_v57 = vsel %vm69_vm0, %v729_v51, 0 }
  0x95   :  { %v832_v58 = vsel %vm69_vm0, %v737_v52, 0  ;;  %923 = vmatpush.bf16.xpose.msra.mxu1 %v808_v57  ;;  %v72_v52 = vpop.xlane.xlu0 %71 }
  0x96   :  { %972 = vmatpush.bf16.xpose.msra.mxu2 %v832_v58 }
  0x9a   :  { %v700_v53 = vld [vmem:[%s3554_s3 + $0x1b0] sm:$0xff]  ;;  %v701_v54 = vld [vmem:[%s3554_s3 + $0x1b8] sm:$0xff] }
  0x9b   :  { %1446 = vst.msk [vmem:[%s3556_s5 + $0xb0] sm:$0xff] %vm69_vm0, %v668_v46  ;;  %v745_v56 = vpack.c.bf16 %v701_v54, %v700_v53 }
  0x9c   :  { %1447 = vst.msk [vmem:[%s3556_s5 + $0xb8] sm:$0xff] %vm69_vm0, %v669_v48 }
  0x9d   :  { %1462 = vst.msk [vmem:[%s3556_s5 + $0x130] sm:$0xff] %vm69_vm0, %v684_v49  ;;  %v856_v59 = vsel %vm69_vm0, %v745_v56, 0  ;;  %v84_v49 = vpop.xlane.xlu2 %83 }
  0x9e   :  { %1463 = vst.msk [vmem:[%s3556_s5 + $0x138] sm:$0xff] %vm69_vm0, %v685_v50  ;;  %1021 = vmatpush.bf16.xpose.msra.mxu3 %v856_v59  ;;  %v78_v50 = vpop.xlane.xlu1 %77 }
  0x9f   :  { %1478 = vst.msk [vmem:[%s3556_s5 + $0x1b0] sm:$0xff] %vm69_vm0, %v700_v53  ;;  %v2530_v53 = vadd.f32 1e-12, %v72_v52  ;;  %v2542_v55 = vadd.f32 1e-12, %v78_v50 }
  0xa0   :  { %1479 = vst.msk [vmem:[%s3556_s5 + $0x1b8] sm:$0xff] %vm69_vm0, %v701_v54  ;;  %v2536_v54 = vadd.f32 1e-12, %v84_v49 }
  0xa1   :  { %1564 = vrsqrt.f32 %v2530_v53  ;;  %vm160_vm2 = vweird.f32 %v2542_v55  ;;  %vm140_vm3 = vweird.f32 %v2530_v53 }
  0xa2   :  { %1566 = vrsqrt.f32 %v2536_v54  ;;  %vm180_vm1 = vweird.f32 %v2536_v54 }
  0xa3   :  { %1568 = vrsqrt.f32 %v2542_v55 }
  0xa5   :  { %v87_v56 = vpop.xlane.xlu2 %86 }
  0xa6   :  { %v81_v57 = vpop.xlane.xlu1 %80  ;;  %v2547_v58 = vadd.f32 1e-12, %v87_v56 }
  0xa7   :  { %v650_v60 = vld [vmem:[%s3554_s3 + $0x20] sm:$0xff]  ;;  %v651_v61 = vld [vmem:[%s3554_s3 + $0x28] sm:$0xff]  ;;  %v2549_v59 = vadd.f32 1e-12, %v81_v57 }
  0xa8   :  { %v666_v62 = vld [vmem:[%s3554_s3 + $0xa0] sm:$0xff]  ;;  %v720_v63 = vpack.c.bf16 %v651_v61, %v650_v60  ;;  %1570 = vrsqrt.f32 %v2547_v58  ;;  %vm190_vm13 = vweird.f32 %v2547_v58 }
  0xa9   :  { %1428 = vst.msk [vmem:[%s3556_s5 + $0x20] sm:$0xff] %vm69_vm0, %v650_v60  ;;  %v75_v60 = vpop.xlane.xlu0 %74  ;;  %1572 = vrsqrt.f32 %v2549_v59  ;;  %vm170_vm9 = vweird.f32 %v2549_v59 }
  0xaa   :  { %v781_v13 = vsel %vm69_vm0, %v720_v63, 0 }
  0xab   :  { %875 = vmatpush.bf16.xpose.msra.mxu0 %v781_v13 }
  0xb0   :  { %v667_v3 = vld [vmem:[%s3554_s3 + $0xa8] sm:$0xff]  ;;  %v682_v4 = vld [vmem:[%s3554_s3 + $0x120] sm:$0xff] }
  0xb1   :  { %v683_v5 = vld [vmem:[%s3554_s3 + $0x128] sm:$0xff]  ;;  %v728_v8 = vpack.c.bf16 %v667_v3, %v666_v62 }
  0xb2   :  { %1429 = vst.msk [vmem:[%s3556_s5 + $0x28] sm:$0xff] %vm69_vm0, %v651_v61  ;;  %v736_v9 = vpack.c.bf16 %v683_v5, %v682_v4  ;;  %v2551_v61 = vadd.f32 1e-12, %v75_v60 }
  0xb3   :  { %v805_v15 = vsel %vm69_vm0, %v728_v8, 0  ;;  %v96_v8 = vpop.xlane.xlu2 %95 }
  0xb4   :  { %v829_v16 = vsel %vm69_vm0, %v736_v9, 0  ;;  %924 = vmatpush.bf16.xpose.msra.mxu1 %v805_v15  ;;  %1574 = vrsqrt.f32 %v2551_v61  ;;  %v93_v9 = vpop.xlane.xlu1 %92  ;;  %vm150_vm7 = vweird.f32 %v2551_v61 }
  0xb5   :  { %973 = vmatpush.bf16.xpose.msra.mxu2 %v829_v16 }
  0xb9   :  { %v698_v10 = vld [vmem:[%s3554_s3 + $0x1a0] sm:$0xff]  ;;  %v699_v12 = vld [vmem:[%s3554_s3 + $0x1a8] sm:$0xff] }
  0xba   :  { %1444 = vst.msk [vmem:[%s3556_s5 + $0xa0] sm:$0xff] %vm69_vm0, %v666_v62  ;;  %v744_v14 = vpack.c.bf16 %v699_v12, %v698_v10  ;;  %v2553_v62 = vpop.eup %1564 }
  0xbb   :  { %1445 = vst.msk [vmem:[%s3556_s5 + $0xa8] sm:$0xff] %vm69_vm0, %v667_v3  ;;  %v135_v63 = vmul.f32 %v2553_v62, %v2530_v53  ;;  %v2559_v3 = vpop.eup %1566  ;;  %vm141_vm5 = vweird.f32 %v2553_v62 }
  0xbc   :  { %1460 = vst.msk [vmem:[%s3556_s5 + $0x120] sm:$0xff] %vm69_vm0, %v682_v4  ;;  %v853_v17 = vsel %vm69_vm0, %v744_v14, 0  ;;  %v2562_v4 = vpop.eup %1568  ;;  %v90_v14 = vpop.xlane.xlu0 %89  ;;  %vm181_vm4 = vweird.f32 %v2559_v3  ;;  %vm2627_vm12 = vmor %vm140_vm3, %vm141_vm5 }
  0xbd   :  { %1461 = vst.msk [vmem:[%s3556_s5 + $0x128] sm:$0xff] %vm69_vm0, %v683_v5  ;;  %1022 = vmatpush.bf16.xpose.msra.mxu3 %v853_v17  ;;  %v136_v5 = vmul.f32 %v2553_v62, %v135_v63  ;;  %v155_v13 = vmul.f32 %v2562_v4, %v2542_v55  ;;  %v2575_v17 = vadd.f32 1e-12, %v96_v8  ;;  %vm161_vm8 = vweird.f32 %v2562_v4  ;;  %vm2643_vm14 = vmor %vm180_vm1, %vm181_vm4 }
  0xbe   :  { %1476 = vst.msk [vmem:[%s3556_s5 + $0x1a0] sm:$0xff] %vm69_vm0, %v698_v10  ;;  %v2565_v10 = vpop.eup %1570  ;;  %vm2675_vm3 = vmor %vm160_vm2, %vm161_vm8 }
  0xbf   :  { %1477 = vst.msk [vmem:[%s3556_s5 + $0x1a8] sm:$0xff] %vm69_vm0, %v699_v12  ;;  %v175_v12 = vmul.f32 %v2559_v3, %v2536_v54  ;;  %v2571_v15 = vpop.eup %1572  ;;  %v185_v16 = vmul.f32 %v2565_v10, %v2547_v58  ;;  %1576 = vrsqrt.f32 %v2575_v17  ;;  %vm191_vm15 = vweird.f32 %v2565_v10 }
  0xc0   :  { %vm171_vm10 = vweird.f32 %v2571_v15  ;;  %vm2692_vm2 = vmor %vm190_vm13, %vm191_vm15 }
  0xc1   :  { %vm2662_vm1 = vmor %vm170_vm9, %vm171_vm10 }
  0xc6   :  { %v648_v18 = vld [vmem:[%s3554_s3 + $0x10] sm:$0xff]  ;;  %v649_v19 = vld [vmem:[%s3554_s3 + $0x18] sm:$0xff] }
  0xc7   :  { %v664_v20 = vld [vmem:[%s3554_s3 + $0x90] sm:$0xff]  ;;  %v719_v21 = vpack.c.bf16 %v649_v19, %v648_v18 }
  0xc8   :  { %1426 = vst.msk [vmem:[%s3556_s5 + $0x10] sm:$0xff] %vm69_vm0, %v648_v18  ;;  %v2577_v18 = vpop.eup %1574 }
  0xc9   :  { %v778_v29 = vsel %vm69_vm0, %v719_v21, 0  ;;  %v137_v21 = vmul.f32 0.5, %v136_v5  ;;  %vm151_vm6 = vweird.f32 %v2577_v18 }
  0xca   :  { %876 = vmatpush.bf16.xpose.msra.mxu0 %v778_v29  ;;  %vm2619_vm11 = vmor %vm150_vm7, %vm151_vm6 }
  0xcf   :  { %v665_v22 = vld [vmem:[%s3554_s3 + $0x98] sm:$0xff]  ;;  %v680_v23 = vld [vmem:[%s3554_s3 + $0x110] sm:$0xff] }
  0xd0   :  { %v681_v24 = vld [vmem:[%s3554_s3 + $0x118] sm:$0xff]  ;;  %v727_v25 = vpack.c.bf16 %v665_v22, %v664_v20 }
  0xd1   :  { %1427 = vst.msk [vmem:[%s3556_s5 + $0x18] sm:$0xff] %vm69_vm0, %v649_v19  ;;  %v735_v26 = vpack.c.bf16 %v681_v24, %v680_v23  ;;  %v165_v19 = vmul.f32 %v2571_v15, %v2549_v59 }
  0xd2   :  { %v802_v31 = vsel %vm69_vm0, %v727_v25, 0 }
  0xd3   :  { %v826_v32 = vsel %vm69_vm0, %v735_v26, 0  ;;  %925 = vmatpush.bf16.xpose.msra.mxu1 %v802_v31  ;;  %v166_v25 = vmul.f32 %v2571_v15, %v165_v19  ;;  %v186_v26 = vmul.f32 %v2565_v10, %v185_v16  ;;  %v2593_v31 = vadd.f32 1e-12, %v90_v14 }
  0xd4   :  { %974 = vmatpush.bf16.xpose.msra.mxu2 %v826_v32  ;;  %v105_v32 = vpop.xlane.xlu2 %104 }
  0xd5   :  { %v167_v29 = vmul.f32 0.5, %v166_v25  ;;  %vm200_vm5 = vweird.f32 %v2593_v31 }
  0xd8   :  { %v696_v27 = vld [vmem:[%s3554_s3 + $0x190] sm:$0xff]  ;;  %v697_v28 = vld [vmem:[%s3554_s3 + $0x198] sm:$0xff] }
  0xd9   :  { %1442 = vst.msk [vmem:[%s3556_s5 + $0x90] sm:$0xff] %vm69_vm0, %v664_v20  ;;  %v743_v30 = vpack.c.bf16 %v697_v28, %v696_v27  ;;  %v2581_v20 = vadd.f32 1e-12, %v93_v9 }
  0xda   :  { %1443 = vst.msk [vmem:[%s3556_s5 + $0x98] sm:$0xff] %vm69_vm0, %v665_v22  ;;  %v145_v22 = vmul.f32 %v2577_v18, %v2551_v61 }
  0xdb   :  { %1458 = vst.msk [vmem:[%s3556_s5 + $0x110] sm:$0xff] %vm69_vm0, %v680_v23  ;;  %v850_v33 = vsel %vm69_vm0, %v743_v30, 0  ;;  %v176_v23 = vmul.f32 %v2559_v3, %v175_v12  ;;  %1578 = vrsqrt.f32 %v2581_v20  ;;  %vm210_vm4 = vweird.f32 %v2581_v20 }
  0xdc   :  { %1459 = vst.msk [vmem:[%s3556_s5 + $0x118] sm:$0xff] %vm69_vm0, %v681_v24  ;;  %1023 = vmatpush.bf16.xpose.msra.mxu3 %v850_v33  ;;  %v156_v24 = vmul.f32 %v2562_v4, %v155_v13  ;;  %v102_v33 = vpop.xlane.xlu1 %101  ;;  %1580 = vrsqrt.f32 %v2593_v31  ;;  %v114_v63 = vpop.xlane.xlu2 %113 }
  0xdd   :  { %1474 = vst.msk [vmem:[%s3556_s5 + $0x190] sm:$0xff] %vm69_vm0, %v696_v27  ;;  %v146_v27 = vmul.f32 %v2577_v18, %v145_v22 }
  0xde   :  { %1475 = vst.msk [vmem:[%s3556_s5 + $0x198] sm:$0xff] %vm69_vm0, %v697_v28  ;;  %v138_v28 = vsub.f32 1.5, %v137_v21  ;;  %v2683_v21 = vadd.f32 1e-12, %v114_v63 }
  0xdf   :  { %v147_v30 = vmul.f32 0.5, %v146_v27 }
  0xe4   :  { %v111_v5 = vpop.xlane.xlu1 %110 }
  0xe5   :  { %v646_v34 = vld [vmem:[%s3554_s3] sm:$0xff]  ;;  %v647_v35 = vld [vmem:[%s3554_s3 + $0x8] sm:$0xff]  ;;  %v2667_v12 = vadd.f32 1e-12, %v111_v5 }
  0xe6   :  { %v662_v36 = vld [vmem:[%s3554_s3 + $0x80] sm:$0xff]  ;;  %v718_v37 = vpack.c.bf16 %v647_v35, %v646_v34 }
  0xe7   :  { %1424 = vst.msk [vmem:[%s3556_s5] sm:$0xff] %vm69_vm0, %v646_v34  ;;  %v177_v34 = vmul.f32 0.5, %v176_v23 }
  0xe8   :  { %v775_v45 = vsel %vm69_vm0, %v718_v37, 0  ;;  %v2597_v37 = vadd.f32 1e-12, %v102_v33 }
  0xe9   :  { %877 = vmatpush.bf16.xpose.msra.mxu0 %v775_v45 }
  0xee   :  { %v663_v38 = vld [vmem:[%s3554_s3 + $0x88] sm:$0xff]  ;;  %v678_v39 = vld [vmem:[%s3554_s3 + $0x100] sm:$0xff] }
  0xef   :  { %v679_v40 = vld [vmem:[%s3554_s3 + $0x108] sm:$0xff]  ;;  %v726_v41 = vpack.c.bf16 %v663_v38, %v662_v36 }
  0xf0   :  { %1425 = vst.msk [vmem:[%s3556_s5 + $0x8] sm:$0xff] %vm69_vm0, %v647_v35  ;;  %v734_v42 = vpack.c.bf16 %v679_v40, %v678_v39  ;;  %v157_v35 = vmul.f32 0.5, %v156_v24 }
  0xf1   :  { %v799_v47 = vsel %vm69_vm0, %v726_v41, 0  ;;  %v2605_v41 = vpop.eup %1576 }
  0xf2   :  { %v823_v48 = vsel %vm69_vm0, %v734_v42, 0  ;;  %926 = vmatpush.bf16.xpose.msra.mxu1 %v799_v47  ;;  %v139_v42 = vmul.f32 %v2553_v62, %v138_v28  ;;  %v2610_v45 = vpop.eup %1578  ;;  %v158_v47 = vsub.f32 1.5, %v157_v35  ;;  %v215_v52 = vmul.f32 %v2605_v41, %v2575_v17 }
  0xf3   :  { %975 = vmatpush.bf16.xpose.msra.mxu2 %v823_v48  ;;  %v205_v61 = vmul.f32 %v2610_v45, %v2581_v20  ;;  %v2654_v8 = vpop.eup %1580  ;;  %vm211_vm6 = vweird.f32 %v2610_v45 }
  0xf4   :  { %v143_v57 = vsel %vm2627_vm12, %v2553_v62, %v139_v42  ;;  %v159_v9 = vmul.f32 %v2562_v4, %v158_v47  ;;  %v195_v19 = vmul.f32 %v2654_v8, %v2593_v31  ;;  %v216_v24 = vmul.f32 %v2605_v41, %v215_v52  ;;  %v328_v42 = vpop.xlane.xlu1 %327  ;;  %vm2820_vm10 = vmor %vm210_vm4, %vm211_vm6 }
  0xf5   :  { %v294_v23 = vmul.f32 %v143_v57, %v1919_v2  ;;  %vm201_vm7 = vweird.f32 %v2654_v8 }
  0xf6   :  { %v196_v2 = vmul.f32 %v2654_v8, %v195_v19  ;;  %vm2788_vm8 = vmor %vm200_vm5, %vm201_vm7  ;;  %vm220_vm7 = vweird.f32 %v2575_v17 }
  0xf7   :  { %v694_v43 = vld [vmem:[%s3554_s3 + $0x180] sm:$0xff]  ;;  %v695_v44 = vld [vmem:[%s3554_s3 + $0x188] sm:$0xff]  ;;  %v2726_v35 = vmul.f32 14.285714, %v294_v23 }
  0xf8   :  { %1440 = vst.msk [vmem:[%s3556_s5 + $0x80] sm:$0xff] %vm69_vm0, %v662_v36  ;;  %v742_v46 = vpack.c.bf16 %v695_v44, %v694_v43  ;;  %v2595_v36 = vadd.f32 1e-12, %v105_v32 }
  0xf9   :  { %1441 = vst.msk [vmem:[%s3556_s5 + $0x88] sm:$0xff] %vm69_vm0, %v663_v38  ;;  %v99_v38 = vpop.xlane.xlu0 %98 }
  0xfa   :  { %1456 = vst.msk [vmem:[%s3556_s5 + $0x100] sm:$0xff] %vm69_vm0, %v678_v39  ;;  %v847_v51 = vsel %vm69_vm0, %v742_v46, 0  ;;  %v187_v39 = vmul.f32 0.5, %v186_v26  ;;  %1582 = vrsqrt.f32 %v2595_v36  ;;  %v178_v46 = vsub.f32 1.5, %v177_v34 }
  0xfb   :  { %1457 = vst.msk [vmem:[%s3556_s5 + $0x108] sm:$0xff] %vm69_vm0, %v679_v40  ;;  %1024 = vmatpush.bf16.xpose.msra.mxu3 %v847_v51  ;;  %v148_v40 = vsub.f32 1.5, %v147_v30  ;;  %1584 = vrsqrt.f32 %v2597_v37  ;;  %v2637_v56 = vadd.f32 1e-12, %v99_v38  ;;  %v206_v26 = vmul.f32 %v2610_v45, %v205_v61 }
  0xfc   :  { %1472 = vst.msk [vmem:[%s3556_s5 + $0x180] sm:$0xff] %vm69_vm0, %v694_v43  ;;  %v168_v43 = vsub.f32 1.5, %v167_v29  ;;  %v188_v48 = vsub.f32 1.5, %v187_v39  ;;  %v179_v54 = vmul.f32 %v2559_v3, %v178_v46  ;;  %v217_v34 = vmul.f32 0.5, %v216_v24 }
  0xfd   :  { %1473 = vst.msk [vmem:[%s3556_s5 + $0x188] sm:$0xff] %vm69_vm0, %v695_v44  ;;  %v149_v44 = vmul.f32 %v2577_v18, %v148_v40  ;;  %1586 = vrsqrt.f32 %v2637_v56  ;;  %v207_v38 = vmul.f32 0.5, %v206_v26  ;;  %v197_v39 = vmul.f32 0.5, %v196_v2  ;;  %v331_v40 = vpop.xlane.xlu2 %330 }
  0xfe   :  { %v169_v60 = vmul.f32 %v2571_v15, %v168_v43  ;;  %v189_v59 = vmul.f32 %v2565_v10, %v188_v48  ;;  %v183_v27 = vsel %vm2643_vm14, %v2559_v3, %v179_v54  ;;  %1588 = vrsqrt.f32 %v2667_v12 }
  0xff   :  { %v153_v51 = vsel %vm2619_vm11, %v2577_v18, %v149_v44  ;;  %1590 = vrsqrt.f32 %v2683_v21  ;;  %v2733_v46 = vadd.f32 1e-12, %v331_v40  ;;  %v2738_v48 = vmul.f32 %v183_v27, %v1909_v0 }
 0x100   :  { %v2669_v14 = vpop.eup %1582  ;;  %v295_v18 = vmul.f32 %v153_v51, %v1943_v11  ;;  %v173_v25 = vsel %vm2662_vm1, %v2571_v15, %v169_v60  ;;  %v163_v15 = vsel %vm2675_vm3, %v2562_v4, %v159_v9  ;;  %v193_v30 = vsel %vm2692_vm2, %v2565_v10, %v189_v59 }
 0x101   :  { %v108_v13 = vpop.xlane.xlu0 %107  ;;  %v2685_v22 = vpop.eup %1584  ;;  %v245_v11 = vmul.f32 %v2669_v14, %v2595_v36  ;;  %v297_v3 = vmul.f32 %v173_v25, %v1935_v7  ;;  %v2735_v7 = vadd.f32 1e-12, %v328_v42  ;;  %v296_v49 = vmul.f32 %v163_v15, %v1914_v1 }
 0x102   :  { %v235_v58 = vmul.f32 %v2685_v22, %v2597_v37  ;;  %v2711_v29 = vadd.f32 1e-12, %v108_v13  ;;  %v2720_v32 = vmul.f32 14.285714, %v295_v18  ;;  %v2745_v51 = vmul.f32 %v193_v30, %v1930_v6 }
 0x103   :  { %v246_v28 = vmul.f32 %v2669_v14, %v245_v11  ;;  %v2722_v33 = vpop.eup %1586  ;;  %v218_v52 = vsub.f32 1.5, %v217_v34  ;;  %v208_v53 = vsub.f32 1.5, %v207_v38  ;;  %v198_v1 = vsub.f32 1.5, %v197_v39  ;;  %v337_v11 = vpop.xlane.xlu1 %336 }
 0x104   :  { %1592 = vrsqrt.f32 %v2711_v29  ;;  %v236_v4 = vmul.f32 %v2685_v22, %v235_v58  ;;  %v225_v10 = vmul.f32 %v2722_v33, %v2637_v56  ;;  %v710_v44 = vpack.c.bf16 %v2720_v32, %v2726_v35  ;;  %v2742_v50 = vpop.eup %1588 }
 0x105   :  { %v247_v43 = vmul.f32 0.5, %v246_v28  ;;  %1594 = vrsqrt.f32 %v2733_v46  ;;  %v2751_v0 = vpop.eup %1590  ;;  %v2756_v6 = vmul.f32 14.285714, %v297_v3  ;;  %v265_v5 = vmul.f32 %v2742_v50, %v2667_v12  ;;  %v340_v24 = vpop.xlane.xlu2 %339 }
 0x106   :  { %1526 = vmatmul.msk.bf16.vlgmr.msra.gmra.mxu0 %vm69_vm0, %v710_v44  ;;  %1534 = vmatmul.msk.bf16.vlgmr.msra.gmra.mxu1 %vm69_vm0, %v710_v44  ;;  %v226_v57 = vmul.f32 %v2722_v33, %v225_v10  ;;  %v237_v63 = vmul.f32 0.5, %v236_v4  ;;  %1596 = vrsqrt.f32 %v2735_v7  ;;  %v2767_v9 = vmul.f32 14.285714, %v296_v49 }
 0x107   :  { %1542 = vmatmul.msk.bf16.vlgmr.msra.gmra.mxu2 %vm69_vm0, %v710_v44  ;;  %1550 = vmatmul.msk.bf16.vlgmr.msra.gmra.mxu3 %vm69_vm0, %v710_v44  ;;  %v248_v61 = vsub.f32 1.5, %v247_v43  ;;  %v2770_v62 = vmul.f32 %v2605_v41, %v218_v52  ;;  %v275_v13 = vmul.f32 %v2751_v0, %v2683_v21  ;;  %v266_v16 = vmul.f32 %v2742_v50, %v265_v5 }
 0x108   :  { %v2778_v18 = vmul.f32 %v2610_v45, %v208_v53  ;;  %v2781_v19 = vmul.f32 %v2654_v8, %v198_v1  ;;  %v227_v23 = vmul.f32 0.5, %v226_v57  ;;  %v238_v58 = vsub.f32 1.5, %v237_v63 }
 0x109   :  { %v117_v47 = vpop.xlane.xlu0 %116  ;;  %v2793_v2 = vmul.f32 %v2669_v14, %v248_v61  ;;  %v2795_v27 = vadd.f32 1e-12, %v340_v24  ;;  %v711_v15 = vpack.c.bf16 %v2756_v6, %v2767_v9  ;;  %v267_v30 = vmul.f32 0.5, %v266_v16 }
 0x10a   :  { %v2758_v60 = vpop.eup %1592  ;;  %v2775_v59 = vadd.f32 1e-12, %v117_v47  ;;  %v276_v38 = vmul.f32 %v2751_v0, %v275_v13  ;;  %vm406_vm9 = vweird.f32 %v2733_v46  ;;  %v2807_v39 = vadd.f32 1e-12, %v337_v11 }
 0x10b   :  { %v255_v54 = vmul.f32 %v2758_v60, %v2711_v29  ;;  %v2784_v25 = vpop.eup %1594  ;;  %v203_v4 = vsel %vm2788_vm8, %v2654_v8, %v2781_v19  ;;  %v228_v10 = vsub.f32 1.5, %v227_v23  ;;  %v2825_v44 = vmul.f32 %v2685_v22, %v238_v58  ;;  %v346_v13 = vpop.xlane.xlu1 %345 }
 0x10c   :  { %v401_v34 = vmul.f32 %v2784_v25, %v2733_v46  ;;  %1598 = vrsqrt.f32 %v2775_v59  ;;  %v2802_v31 = vpop.eup %1596  ;;  %vm396_vm11 = vweird.f32 %v2735_v7  ;;  %v268_v47 = vsub.f32 1.5, %v267_v30  ;;  %v1822_v46 = vld [vmem:[%s3552_s1 + $0x38] sm:$0xff] }
 0x10d   :  { %v256_v55 = vmul.f32 %v2758_v60, %v255_v54  ;;  %1600 = vrsqrt.f32 %v2795_v27  ;;  %v391_v42 = vmul.f32 %v2802_v31, %v2735_v7  ;;  %v2832_v1 = vmul.f32 0.5, %v276_v38  ;;  %v349_v54 = vpop.xlane.xlu2 %348 }
 0x10e   :  { %v402_v40 = vmul.f32 %v2784_v25, %v401_v34  ;;  %1602 = vrsqrt.f32 %v2807_v39  ;;  %v2836_v20 = vmul.f32 14.285714, %v2738_v48  ;;  %v2839_v57 = vmul.f32 14.285714, %v2745_v51 }
 0x10f   :  { %v257_v3 = vmul.f32 0.5, %v256_v55  ;;  %v392_v53 = vmul.f32 %v2802_v31, %v391_v42  ;;  %v2844_v63 = vmul.f32 %v2722_v33, %v228_v10  ;;  %vm407_vm12 = vweird.f32 %v2784_v25 }
 0x110   :  { %v403_v52 = vmul.f32 0.5, %v402_v40  ;;  %v213_v16 = vsel %vm2820_vm10, %v2610_v45, %v2778_v18  ;;  %vm397_vm13 = vweird.f32 %v2802_v31  ;;  %vm436_vm14 = vweird.f32 %v2795_v27  ;;  %vm2873_vm15 = vmor %vm406_vm9, %vm407_vm12 }
 0x111   :  { %v334_v28 = vpop.xlane.xlu0 %333  ;;  %v258_v49 = vsub.f32 1.5, %v257_v3  ;;  %v393_v5 = vmul.f32 0.5, %v392_v53  ;;  %v2855_v51 = vadd.f32 1e-12, %v349_v54  ;;  %v2857_v23 = vadd.f32 1e-12, %v346_v13  ;;  %vm2893_vm1 = vmor %vm396_vm11, %vm397_vm13 }
 0x112   :  { %v2829_v8 = vadd.f32 1e-12, %v334_v28  ;;  %v2841_v61 = vpop.eup %1598  ;;  %v404_v19 = vsub.f32 1.5, %v403_v52  ;;  %v2860_v24 = vmul.f32 %v2742_v50, %v268_v47  ;;  %v2884_v30 = vpack.c.bf16 %v2839_v57, %v2836_v20 }
 0x113   :  { %v2851_v48 = vpop.eup %1600  ;;  %v2863_v11 = vmul.f32 %v2758_v60, %v258_v49  ;;  %v394_v26 = vsub.f32 1.5, %v393_v5  ;;  %v301_v3 = vmul.f32 %v1822_v46, %v213_v16  ;;  %v285_v38 = vmul.f32 %v2841_v61, %v2775_v59  ;;  %v1825_v46 = vld [vmem:[%s3553_s2 + $0x8] sm:$0xff] }
 0x114   :  { %1604 = vrsqrt.f32 %v2829_v8  ;;  %v431_v45 = vmul.f32 %v2851_v48, %v2795_v27  ;;  %v2867_v18 = vpop.eup %1602  ;;  %vm426_vm3 = vweird.f32 %v2807_v39  ;;  %vm416_vm2 = vweird.f32 %v2829_v8  ;;  %v1828_v27 = vld [vmem:[%s3553_s2 + $0x10] sm:$0xff] }
 0x115   :  { %1606 = vrsqrt.f32 %v2855_v51  ;;  %v421_v40 = vmul.f32 %v2867_v18, %v2807_v39  ;;  %v395_v7 = vmul.f32 %v2802_v31, %v394_v26  ;;  %v405_v43 = vmul.f32 %v2784_v25, %v404_v19  ;;  %v358_v34 = vpop.xlane.xlu2 %357 }
 0x116   :  { %1527 = vmatmul.msk.bf16.gmra.mxu0 %vm69_vm0, %v711_v15  ;;  %1535 = vmatmul.msk.bf16.gmra.mxu1 %vm69_vm0, %v711_v15  ;;  %v432_v10 = vmul.f32 %v2851_v48, %v431_v45  ;;  %1608 = vrsqrt.f32 %v2857_v23  ;;  %v2926_v13 = vmul.f32 14.285714, %v301_v3  ;;  %v286_v16 = vmul.f32 %v2841_v61, %v285_v38  ;;  %v1824_v45 = vld [vmem:[%s3553_s2] sm:$0xff] }
 0x117   :  { %1543 = vmatmul.msk.bf16.gmra.mxu2 %vm69_vm0, %v711_v15  ;;  %1551 = vmatmul.msk.bf16.gmra.mxu3 %vm69_vm0, %v711_v15  ;;  %v422_v49 = vmul.f32 %v2867_v18, %v421_v40  ;;  %v1823_v15 = vld [vmem:[%s3552_s1 + $0x30] sm:$0xff]  ;;  %v399_v5 = vsel %vm2893_vm1, %v2802_v31, %v395_v7  ;;  %v409_v54 = vsel %vm2873_vm15, %v2784_v25, %v405_v43  ;;  %vm437_vm4 = vweird.f32 %v2851_v48 }
 0x118   :  { %v433_v47 = vmul.f32 0.5, %v432_v10  ;;  %v2917_v53 = vmul.f32 %v1823_v15, %v203_v4  ;;  %vm427_vm5 = vweird.f32 %v2867_v18  ;;  %v550_v58 = vmul.f32 %v1824_v45, %v399_v5  ;;  %vm2967_vm9 = vmor %vm436_vm14, %vm437_vm4 }
 0x119   :  { %v343_v55 = vpop.xlane.xlu0 %342  ;;  %v423_v19 = vmul.f32 0.5, %v422_v49  ;;  %v551_v3 = vmul.f32 %v1825_v46, %v409_v54  ;;  %vm221_vm8 = vweird.f32 %v2605_v41  ;;  %v2976_v54 = vadd.f32 1e-12, %v358_v34  ;;  %vm2984_vm10 = vmor %vm426_vm3, %vm427_vm5 }
 0x11a   :  { %v2880_v28 = vadd.f32 1e-12, %v343_v55  ;;  %v2905_v42 = vpop.eup %1604  ;;  %v355_v55 = vpop.xlane.xlu1 %354  ;;  %v434_v38 = vsub.f32 1.5, %v433_v47  ;;  %1489 = vst.msk [vmem:[%s2937_s20] sm:$0xff] %vm69_vm0, %v550_v58  ;;  %vm466_vm11 = vweird.f32 %v2855_v51  ;;  %vm456_vm13 = vweird.f32 %v2857_v23 }
 0x11b   :  { %v411_v52 = vmul.f32 %v2905_v42, %v2829_v8  ;;  %v2939_v31 = vpop.eup %1606  ;;  %v2942_v25 = vadd.f32 1e-12, %v355_v55  ;;  %vm417_vm6 = vweird.f32 %v2905_v42  ;;  %v424_v43 = vsub.f32 1.5, %v423_v19  ;;  %1490 = vst.msk [vmem:[%s2937_s20 + $0x8] sm:$0xff] %vm69_vm0, %v551_v3 }
 0x11c   :  { %1610 = vrsqrt.f32 %v2880_v28  ;;  %v461_v40 = vmul.f32 %v2939_v31, %v2855_v51  ;;  %v2953_v7 = vpop.eup %1608  ;;  %v583_v55 = vmul.f32 %v2720_v32, %v551_v3  ;;  %vm2998_vm12 = vmor %vm416_vm2, %vm417_vm6  ;;  %v435_v3 = vmul.f32 %v2851_v48, %v434_v38 }
 0x11d   :  { %v412_v4 = vmul.f32 %v2905_v42, %v411_v52  ;;  %1612 = vrsqrt.f32 %v2942_v25  ;;  %v582_v52 = vmul.f32 %v2726_v35, %v550_v58  ;;  %v451_v35 = vmul.f32 %v2953_v7, %v2857_v23 }
 0x11e   :  { %v462_v5 = vmul.f32 %v2939_v31, %v461_v40  ;;  %v601_v32 = vsel %vm69_vm0, %v583_v55, 0.0  ;;  %vm467_vm14 = vweird.f32 %v2939_v31  ;;  %vm446_vm15 = vweird.f32 %v2880_v28 }
 0x11f   :  { %v413_v10 = vmul.f32 0.5, %v412_v4  ;;  %v598_v4 = vsel %vm69_vm0, %v582_v52, 0.0  ;;  %v452_v58 = vmul.f32 %v2953_v7, %v451_v35  ;;  %602 = vadd.xlane.f32.xlu0 %v601_v32  ;;  %vm230_vm1 = vweird.f32 %v2637_v56  ;;  %vm3064_vm5 = vmor %vm466_vm11, %vm467_vm14 }
 0x120   :  { %v463_v45 = vmul.f32 0.5, %v462_v5  ;;  %599 = vadd.xlane.f32.xlu2 %v598_v4  ;;  %vm231_vm3 = vweird.f32 %v2722_v33  ;;  %vm457_vm2 = vweird.f32 %v2953_v7  ;;  %v439_v40 = vsel %vm2967_vm9, %v2851_v48, %v435_v3  ;;  %v1826_v48 = vld [vmem:[%s3553_s2 + $0x18] sm:$0xff]  ;;  %vm3086_vm14 = vmor %vm220_vm7, %vm221_vm8 }
 0x121   :  { %v352_v26 = vpop.xlane.xlu0 %351  ;;  %v414_v15 = vsub.f32 1.5, %v413_v10  ;;  %v453_v5 = vmul.f32 0.5, %v452_v58  ;;  %vm241_vm6 = vweird.f32 %v2685_v22  ;;  %v223_v23 = vsel %vm3086_vm14, %v2605_v41, %v2770_v62 }
 0x122   :  { %v2956_v49 = vadd.f32 1e-12, %v352_v26  ;;  %v2978_v19 = vpop.eup %1610  ;;  %v2992_v26 = vmul.f32 0.5, %v286_v16  ;;  %v425_v16 = vmul.f32 %v2867_v18, %v424_v43  ;;  %v364_v56 = vpop.xlane.xlu1 %363 }
 0x123   :  { %v441_v46 = vmul.f32 %v2978_v19, %v2880_v28  ;;  %v415_v8 = vmul.f32 %v2905_v42, %v414_v15  ;;  %v3014_v10 = vpop.eup %1612  ;;  %v464_v15 = vsub.f32 1.5, %v463_v45  ;;  %vm447_vm9 = vweird.f32 %v2978_v19 }
 0x124   :  { %1614 = vrsqrt.f32 %v2956_v49  ;;  %v429_v38 = vsel %vm2984_vm10, %v2867_v18, %v425_v16  ;;  %v481_v4 = vmul.f32 %v3014_v10, %v2942_v25  ;;  %vm476_vm4 = vweird.f32 %v2956_v49  ;;  %vm3101_vm7 = vmor %vm446_vm15, %vm447_vm9 }
 0x125   :  { %v442_v34 = vmul.f32 %v2978_v19, %v441_v46  ;;  %1616 = vrsqrt.f32 %v2976_v54  ;;  %v419_v43 = vsel %vm2998_vm12, %v2905_v42, %v415_v8  ;;  %v553_v18 = vmul.f32 %v1826_v48, %v429_v38  ;;  %v1827_v42 = vld [vmem:[%s3553_s2 + $0x20] sm:$0xff]  ;;  %vm3116_vm15 = vmor %vm456_vm13, %vm457_vm2 }
 0x126   :  { %1528 = vmatmul.msk.bf16.gmra.mxu0 %vm69_vm0, %v2884_v30  ;;  %1536 = vmatmul.msk.bf16.gmra.mxu1 %vm69_vm0, %v2884_v30  ;;  %v554_v47 = vmul.f32 %v1827_v42, %v439_v40  ;;  %v552_v39 = vmul.f32 %v1828_v27, %v419_v43  ;;  %v482_v46 = vmul.f32 %v3014_v10, %v481_v4  ;;  %vm251_vm12 = vweird.f32 %v2669_v14  ;;  %vm3146_vm13 = vmor %vm230_vm1, %vm231_vm3 }
 0x127   :  { %v443_v35 = vmul.f32 0.5, %v442_v34  ;;  %1544 = vmatmul.msk.bf16.gmra.mxu2 %vm69_vm0, %v2884_v30  ;;  %1552 = vmatmul.msk.bf16.gmra.mxu3 %vm69_vm0, %v2884_v30  ;;  %v585_v3 = vmul.f32 %v2756_v6, %v553_v18  ;;  %1492 = vst.msk [vmem:[%s2937_s20 + $0x18] sm:$0xff] %vm69_vm0, %v553_v18  ;;  %v454_v38 = vsub.f32 1.5, %v453_v5  ;;  %vm487_vm11 = vweird.f32 %v3014_v10  ;;  %v1829_v18 = vld [vmem:[%s3553_s2 + $0x38] sm:$0xff] }
 0x128   :  { %v586_v8 = vmul.f32 %v2836_v20, %v554_v47  ;;  %v584_v30 = vmul.f32 %v2767_v9, %v552_v39  ;;  %1493 = vst.msk [vmem:[%s2937_s20 + $0x20] sm:$0xff] %vm69_vm0, %v554_v47  ;;  %v465_v6 = vmul.f32 %v2939_v31, %v464_v15  ;;  %v367_v15 = vpop.xlane.xlu2 %366  ;;  %v3105_v5 = vmul.f32 0.5, %v482_v46 }
 0x129   :  { %v361_v52 = vpop.xlane.xlu0 %360  ;;  %v444_v58 = vsub.f32 1.5, %v443_v35  ;;  %v607_v20 = vsel %vm69_vm0, %v585_v3, 0.0  ;;  %1491 = vst.msk [vmem:[%s2937_s20 + $0x10] sm:$0xff] %vm69_vm0, %v552_v39  ;;  %vm496_vm10 = vweird.f32 %v2976_v54  ;;  %v455_v27 = vmul.f32 %v2953_v7, %v454_v38 }
 0x12a   :  { %v3031_v55 = vpop.eup %1614  ;;  %v3046_v45 = vadd.f32 1e-12, %v361_v52  ;;  %v610_v40 = vsel %vm69_vm0, %v586_v8, 0.0  ;;  %v604_v43 = vsel %vm69_vm0, %v584_v30, 0.0  ;;  %608 = vadd.xlane.f32.xlu2 %v607_v20  ;;  %v469_v4 = vsel %vm3064_vm5, %v2939_v31, %v465_v6  ;;  %v1831_v6 = vld [vmem:[%s3553_s2 + $0x30] sm:$0xff] }
 0x12b   :  { %v471_v32 = vmul.f32 %v3031_v55, %v2956_v49  ;;  %v3074_v34 = vpop.eup %1616  ;;  %vm477_vm8 = vweird.f32 %v3031_v55  ;;  %611 = vadd.xlane.f32.xlu0 %v610_v40  ;;  %605 = vadd.xlane.f32.xlu1 %v604_v43  ;;  %v557_v42 = vmul.f32 %v1829_v18, %v469_v4  ;;  %v445_v31 = vmul.f32 %v2978_v19, %v444_v58 }
 0x12c   :  { %1618 = vrsqrt.f32 %v3046_v45  ;;  %v491_v52 = vmul.f32 %v3074_v34, %v2976_v54  ;;  %vm506_vm9 = vweird.f32 %v3046_v45  ;;  %v3131_v39 = vadd.f32 1e-12, %v367_v15  ;;  %vm3163_vm1 = vmor %vm476_vm4, %vm477_vm8 }
 0x12d   :  { %v472_v51 = vmul.f32 %v3031_v55, %v471_v32  ;;  %v589_v16 = vmul.f32 %v2926_v13, %v557_v42  ;;  %1496 = vst.msk [vmem:[%s2937_s20 + $0x38] sm:$0xff] %vm69_vm0, %v557_v42  ;;  %v572_v3 = vmul.f32 14.285714, %v2917_v53  ;;  %v449_v58 = vsel %vm3101_vm7, %v2978_v19, %v445_v31  ;;  %v1830_v53 = vld [vmem:[%s3553_s2 + $0x28] sm:$0xff] }
 0x12e   :  { %v492_v48 = vmul.f32 %v3074_v34, %v491_v52  ;;  %v484_v62 = vsub.f32 1.5, %v3105_v5  ;;  %v555_v30 = vmul.f32 %v1830_v53, %v449_v58  ;;  %v459_v19 = vsel %vm3116_vm15, %v2953_v7, %v455_v27  ;;  %v1832_v7 = vld [vmem:[%s3552_s1 + $0x40] sm:$0xff]  ;;  %v1836_v53 = vld [vmem:[%s3553_s2 + $0x48] sm:$0xff] }
 0x12f   :  { %v473_v35 = vmul.f32 0.5, %v472_v51  ;;  %vm497_vm3 = vweird.f32 %v3074_v34  ;;  %v619_v51 = vsel %vm69_vm0, %v589_v16, 0.0  ;;  %v556_v9 = vmul.f32 %v1831_v6, %v459_v19  ;;  %v373_v19 = vpop.xlane.xlu1 %372 }
 0x130   :  { %v493_v32 = vmul.f32 0.5, %v492_v48  ;;  %v302_v20 = vmul.f32 %v1832_v7, %v223_v23  ;;  %vm270_vm2 = vweird.f32 %v2667_v12  ;;  %vm271_vm4 = vweird.f32 %v2742_v50  ;;  %1494 = vst.msk [vmem:[%s2937_s20 + $0x28] sm:$0xff] %vm69_vm0, %v555_v30  ;;  %v1847_v12 = vld [vmem:[%s3553_s2 + $0x70] sm:$0xff] }
 0x131   :  { %v474_v47 = vsub.f32 1.5, %v473_v35  ;;  %v587_v40 = vmul.f32 %v2839_v57, %v555_v30  ;;  %1620 = vrsqrt.f32 %v3131_v39  ;;  %vm3595_vm5 = vweird.f32 %v2597_v37  ;;  %1495 = vst.msk [vmem:[%s2937_s20 + $0x30] sm:$0xff] %vm69_vm0, %v556_v9  ;;  %v370_v7 = vpop.xlane.xlu0 %369 }
 0x132   :  { %v3133_v46 = vpop.eup %1618  ;;  %vm3187_vm14 = vmor %vm3595_vm5, %vm241_vm6  ;;  %vm260_vm7 = vweird.f32 %v2711_v29  ;;  %vm261_vm8 = vweird.f32 %v2758_v60  ;;  %v494_v15 = vsub.f32 1.5, %v493_v32  ;;  %v713_v57 = vpack.c.bf16 %v2926_v13, %v572_v3 }
 0x133   :  { %v501_v8 = vmul.f32 %v3133_v46, %v3046_v45  ;;  %v475_v43 = vmul.f32 %v3031_v55, %v474_v47  ;;  %vm507_vm15 = vweird.f32 %v3133_v46  ;;  %v3197_v17 = vadd.f32 1e-12, %v364_v56  ;;  %620 = vadd.xlane.f32.xlu0 %v619_v51 }
 0x134   :  { %vm3598_vm6 = vweird.f32 %v2595_v36  ;;  %v613_v35 = vsel %vm69_vm0, %v587_v40, 0.0  ;;  %v233_v4 = vsel %vm3146_vm13, %v2722_v33, %v2844_v63  ;;  %v588_v28 = vmul.f32 %v572_v3, %v556_v9  ;;  %v1834_v63 = vld [vmem:[%s3552_s1 + $0x48] sm:$0xff]  ;;  %v1839_v40 = vld [vmem:[%s3553_s2 + $0x58] sm:$0xff]  ;;  %vm3314_vm13 = vmor %vm270_vm2, %vm271_vm4 }
 0x135   :  { %v502_v49 = vmul.f32 %v3133_v46, %v501_v8  ;;  %vm3203_vm5 = vmor %vm3598_vm6, %vm251_vm12  ;;  %v479_v13 = vsel %vm3163_vm1, %v3031_v55, %v475_v43  ;;  %vm3601_vm12 = vweird.f32 %v2942_v25  ;;  %614 = vadd.xlane.f32.xlu1 %v613_v35  ;;  %v1833_v55 = vld [vmem:[%s3553_s2 + $0x40] sm:$0xff]  ;;  %v3226_v18 = vmul.f32 14.285714, %v302_v20 }
 0x136   :  { %vm3219_vm6 = vmor %vm3601_vm12, %vm487_vm11  ;;  %v558_v48 = vmul.f32 %v1833_v55, %v479_v13  ;;  %1622 = vrsqrt.f32 %v3197_v17  ;;  %v303_v25 = vmul.f32 %v1834_v63, %v233_v4  ;;  %v485_v42 = vmul.f32 %v3014_v10, %v484_v62  ;;  %1529 = vmatmul.msk.bf16.gmra.mxu0 %vm69_vm0, %v713_v57  ;;  %1537 = vmatmul.msk.bf16.gmra.mxu1 %vm69_vm0, %v713_v57 }
 0x137   :  { %v503_v5 = vmul.f32 0.5, %v502_v49  ;;  %v243_v31 = vsel %vm3187_vm14, %v2685_v22, %v2825_v44  ;;  %vm3241_vm11 = vmor %vm496_vm10, %vm497_vm3  ;;  %v1835_v22 = vld [vmem:[%s3552_s1 + $0x50] sm:$0xff]  ;;  %v495_v23 = vmul.f32 %v3074_v34, %v494_v15  ;;  %v3254_v54 = vpop.eup %1620  ;;  %v278_v32 = vsub.f32 1.5, %v2832_v1  ;;  %1545 = vmatmul.msk.bf16.gmra.mxu2 %vm69_vm0, %v713_v57  ;;  %1553 = vmatmul.msk.bf16.gmra.mxu3 %vm69_vm0, %v713_v57 }
 0x138   :  { %v590_v27 = vmul.f32 %v3226_v18, %v558_v48  ;;  %1497 = vst.msk [vmem:[%s2937_s20 + $0x40] sm:$0xff] %vm69_vm0, %v558_v48  ;;  %v304_v44 = vmul.f32 %v1835_v22, %v243_v31  ;;  %vm3261_vm10 = vmor %vm506_vm9, %vm507_vm15  ;;  %v489_v3 = vsel %vm3219_vm6, %v3014_v10, %v485_v42  ;;  %v253_v58 = vsel %vm3203_vm5, %v2669_v14, %v2793_v2  ;;  %v1840_v42 = vld [vmem:[%s3552_s1 + $0x68] sm:$0xff] }
 0x139   :  { %v504_v33 = vsub.f32 1.5, %v503_v5  ;;  %v288_v45 = vsub.f32 1.5, %v2992_v26  ;;  %v521_v8 = vmul.f32 %v3254_v54, %v3131_v39  ;;  %v559_v10 = vmul.f32 %v1836_v53, %v489_v3  ;;  %v1837_v26 = vld [vmem:[%s3552_s1 + $0x58] sm:$0xff]  ;;  %vm3328_vm3 = vmor %vm260_vm7, %vm261_vm8  ;;  %v1842_v22 = vld [vmem:[%s3553_s2 + $0x68] sm:$0xff] }
 0x13a   :  { %v622_v62 = vsel %vm69_vm0, %v590_v27, 0.0  ;;  %vm526_vm9 = vweird.f32 %v3131_v39  ;;  %v499_v14 = vsel %vm3241_vm11, %v3074_v34, %v495_v23  ;;  %v3286_v2 = vmul.f32 14.285714, %v304_v44  ;;  %v1838_v34 = vld [vmem:[%s3553_s2 + $0x50] sm:$0xff] }
 0x13b   :  { %v505_v41 = vmul.f32 %v3133_v46, %v504_v33  ;;  %623 = vadd.xlane.f32.xlu2 %v622_v62  ;;  %v305_v30 = vmul.f32 %v1837_v26, %v253_v58  ;;  %v616_v38 = vsel %vm69_vm0, %v588_v28, 0.0  ;;  %v522_v51 = vmul.f32 %v3254_v54, %v521_v8  ;;  %1498 = vst.msk [vmem:[%s2937_s20 + $0x48] sm:$0xff] %vm69_vm0, %v559_v10  ;;  %v1843_v62 = vld [vmem:[%s3553_s2 + $0x60] sm:$0xff] }
 0x13c   :  { %v3291_v56 = vpop.eup %1622  ;;  %v560_v6 = vmul.f32 %v1838_v34, %v499_v14  ;;  %v575_v49 = vmul.f32 14.285714, %v303_v25  ;;  %vm527_vm1 = vweird.f32 %v3254_v54  ;;  %v3322_v37 = vadd.f32 1e-12, %v373_v19 }
 0x13d   :  { %v509_v9 = vsel %vm3261_vm10, %v3133_v46, %v505_v41  ;;  %v511_v20 = vmul.f32 %v3291_v56, %v3197_v17  ;;  %v3308_v52 = vmul.f32 14.285714, %v305_v30  ;;  %617 = vadd.xlane.f32.xlu1 %v616_v38  ;;  %v523_v46 = vmul.f32 0.5, %v522_v51  ;;  %vm3343_vm4 = vmor %vm526_vm9, %vm527_vm1 }
 0x13e   :  { %v561_v43 = vmul.f32 %v1839_v40, %v509_v9  ;;  %v592_v57 = vmul.f32 %v3286_v2, %v560_v6  ;;  %1499 = vst.msk [vmem:[%s2937_s20 + $0x50] sm:$0xff] %vm69_vm0, %v560_v6  ;;  %vm516_vm2 = vweird.f32 %v3197_v17  ;;  %v3337_v13 = vadd.f32 1e-12, %v370_v7 }
 0x13f   :  { %v512_v5 = vmul.f32 %v3291_v56, %v511_v20  ;;  %v524_v4 = vsub.f32 1.5, %v523_v46  ;;  %v591_v36 = vmul.f32 %v575_v49, %v559_v10  ;;  %1624 = vrsqrt.f32 %v3322_v37  ;;  %v1846_v46 = vld [vmem:[%s3553_s2 + $0x78] sm:$0xff] }
 0x140   :  { %v593_v35 = vmul.f32 %v3308_v52, %v561_v43  ;;  %1500 = vst.msk [vmem:[%s2937_s20 + $0x58] sm:$0xff] %vm69_vm0, %v561_v43  ;;  %v628_v28 = vsel %vm69_vm0, %v592_v57, 0.0  ;;  %vm517_vm14 = vweird.f32 %v3291_v56  ;;  %1626 = vrsqrt.f32 %v3337_v13 }
 0x141   :  { %v513_v55 = vmul.f32 0.5, %v512_v5  ;;  %629 = vadd.xlane.f32.xlu0 %v628_v28  ;;  %vm290_vm7 = vweird.f32 %v2775_v59  ;;  %v273_v33 = vsel %vm3314_vm13, %v2742_v50, %v2860_v24  ;;  %v525_v39 = vmul.f32 %v3254_v54, %v524_v4  ;;  %v1841_v50 = vld [vmem:[%s3552_s1 + $0x60] sm:$0xff]  ;;  %vm3374_vm12 = vmor %vm516_vm2, %vm517_vm14 }
 0x142   :  { %v631_v48 = vsel %vm69_vm0, %v593_v35, 0.0  ;;  %v263_v63 = vsel %vm3328_vm3, %v2758_v60, %v2863_v11  ;;  %vm291_vm8 = vweird.f32 %v2841_v61  ;;  %v307_v31 = vmul.f32 %v1840_v42, %v273_v33 }
 0x143   :  { %v514_v25 = vsub.f32 1.5, %v513_v55  ;;  %632 = vadd.xlane.f32.xlu2 %v631_v48  ;;  %v306_v24 = vmul.f32 %v1841_v50, %v263_v63  ;;  %vm280_vm15 = vweird.f32 %v2683_v21  ;;  %vm281_vm5 = vweird.f32 %v2751_v0  ;;  %vm3395_vm6 = vmor %vm290_vm7, %vm291_vm8 }
 0x144   :  { %v289_v60 = vmul.f32 %v2841_v61, %v288_v45  ;;  %v529_v47 = vsel %vm3343_vm4, %v3254_v54, %v525_v39  ;;  %v625_v27 = vsel %vm69_vm0, %v591_v36, 0.0  ;;  %v3385_v23 = vmul.f32 14.285714, %v307_v31  ;;  %vm3404_vm11 = vmor %vm280_vm15, %vm281_vm5 }
 0x145   :  { %v563_v44 = vmul.f32 %v1842_v22, %v529_v47  ;;  %v515_v17 = vmul.f32 %v3291_v56, %v514_v25  ;;  %v1625_v16 = vpop.eup %1624  ;;  %v279_v3 = vmul.f32 %v2751_v0, %v278_v32  ;;  %v714_v58 = vpack.c.bf16 %v575_v49, %v3226_v18  ;;  %626 = vadd.xlane.f32.xlu1 %v625_v27 }
 0x146   :  { %v578_v41 = vmul.f32 14.285714, %v306_v24  ;;  %v1627_v45 = vpop.eup %1626  ;;  %v541_v32 = vmul.f32 %v1625_v16, %v3322_v37  ;;  %v293_v14 = vsel %vm3395_vm6, %v2841_v61, %v289_v60  ;;  %vm546_vm10 = vweird.f32 %v3322_v37  ;;  %v1844_v61 = vld [vmem:[%s3552_s1 + $0x78] sm:$0xff] }
 0x147   :  { %v595_v59 = vmul.f32 %v3385_v23, %v563_v44  ;;  %1502 = vst.msk [vmem:[%s2937_s20 + $0x68] sm:$0xff] %vm69_vm0, %v563_v44  ;;  %v519_v18 = vsel %vm3374_vm12, %v3291_v56, %v515_v17  ;;  %1530 = vmatmul.msk.bf16.gmra.mxu0 %vm69_vm0, %v714_v58  ;;  %1538 = vmatmul.msk.bf16.gmra.mxu1 %vm69_vm0, %v714_v58  ;;  %vm547_vm9 = vweird.f32 %v1625_v16  ;;  %vm536_vm13 = vweird.f32 %v3337_v13 }
 0x148   :  { %v531_v21 = vmul.f32 %v1627_v45, %v3337_v13  ;;  %v562_v8 = vmul.f32 %v1843_v62, %v519_v18  ;;  %1546 = vmatmul.msk.bf16.gmra.mxu2 %vm69_vm0, %v714_v58  ;;  %1554 = vmatmul.msk.bf16.gmra.mxu3 %vm69_vm0, %v714_v58  ;;  %v542_v53 = vmul.f32 %v1625_v16, %v541_v32  ;;  %vm537_vm1 = vweird.f32 %v1627_v45  ;;  %vm548_vm3 = vmor %vm546_vm10, %vm547_vm9 }
 0x149   :  { %v637_v10 = vsel %vm69_vm0, %v595_v59, 0.0  ;;  %v283_v19 = vsel %vm3404_vm11, %v2751_v0, %v279_v3  ;;  %v309_v34 = vmul.f32 %v1844_v61, %v293_v14  ;;  %v1845_v0 = vld [vmem:[%s3552_s1 + $0x70] sm:$0xff]  ;;  %vm538_vm2 = vmor %vm536_vm13, %vm537_vm1  ;;  %v715_v4 = vpack.c.bf16 %v3308_v52, %v3286_v2 }
 0x14a   :  { %v532_v26 = vmul.f32 %v1627_v45, %v531_v21  ;;  %638 = vadd.xlane.f32.xlu0 %v637_v10  ;;  %v594_v30 = vmul.f32 %v578_v41, %v562_v8  ;;  %1501 = vst.msk [vmem:[%s2937_s20 + $0x60] sm:$0xff] %vm69_vm0, %v562_v8  ;;  %v543_v56 = vmul.f32 0.5, %v542_v53  ;;  %v308_v9 = vmul.f32 %v1845_v0, %v283_v19 }
 0x14b   :  { %v581_v49 = vmul.f32 14.285714, %v309_v34  ;;  %v716_v29 = vpack.c.bf16 %v3385_v23, %v578_v41  ;;  %vm1421_vm14 = vcmask 0  }
 0x14c   :  { %v533_v38 = vmul.f32 0.5, %v532_v26  ;;  %v634_v51 = vsel %vm69_vm0, %v594_v30, 0.0  ;;  %v544_v6 = vsub.f32 1.5, %v543_v56  ;;  %v580_v15 = vmul.f32 14.285714, %v308_v9 }
 0x14d   :  { %635 = vadd.xlane.f32.xlu1 %v634_v51 }
 0x14e   :  { %v534_v7 = vsub.f32 1.5, %v533_v38  ;;  %v545_v20 = vmul.f32 %v1625_v16, %v544_v6  ;;  %v717_v2 = vpack.c.bf16 %v581_v49, %v580_v15 }
 0x150   :  { %v535_v40 = vmul.f32 %v1627_v45, %v534_v7  ;;  %v549_v43 = vsel %vm548_vm3, %v1625_v16, %v545_v20 }
 0x151   :  { %v565_v57 = vmul.f32 %v1846_v46, %v549_v43 }
 0x152   :  { %v539_v37 = vsel %vm538_vm2, %v1627_v45, %v535_v40 }
 0x153   :  { %v564_v5 = vmul.f32 %v1847_v12, %v539_v37  ;;  %v597_v35 = vmul.f32 %v581_v49, %v565_v57  ;;  %1504 = vst.msk [vmem:[%s2937_s20 + $0x78] sm:$0xff] %vm69_vm0, %v565_v57 }
 0x155   :  { %v596_v13 = vmul.f32 %v580_v15, %v564_v5  ;;  %1503 = vst.msk [vmem:[%s2937_s20 + $0x70] sm:$0xff] %vm69_vm0, %v564_v5  ;;  %v643_v36 = vsel %vm69_vm0, %v597_v35, 0.0 }
 0x156   :  { %644 = vadd.xlane.f32.xlu1 %v643_v36 }
 0x157   :  { %v640_v28 = vsel %vm69_vm0, %v596_v13, 0.0  ;;  %1531 = vmatmul.msk.bf16.gmra.mxu0 %vm69_vm0, %v715_v4  ;;  %1539 = vmatmul.msk.bf16.gmra.mxu1 %vm69_vm0, %v715_v4 }
 0x158   :  { %1547 = vmatmul.msk.bf16.gmra.mxu2 %vm69_vm0, %v715_v4  ;;  %1555 = vmatmul.msk.bf16.gmra.mxu3 %vm69_vm0, %v715_v4 }
 0x159   :  { %641 = vadd.xlane.f32.xlu2 %v640_v28 }
 0x167   :  { %1532 = vmatmul.msk.bf16.gmra.mxu0 %vm69_vm0, %v716_v29  ;;  %1540 = vmatmul.msk.bf16.gmra.mxu1 %vm69_vm0, %v716_v29 }
 0x168   :  { %1548 = vmatmul.msk.bf16.gmra.mxu2 %vm69_vm0, %v716_v29  ;;  %1556 = vmatmul.msk.bf16.gmra.mxu3 %vm69_vm0, %v716_v29 }
 0x177   :  { %1533 = vmatmul.msk.bf16.gmra.mxu0 %vm69_vm0, %v717_v2  ;;  %1541 = vmatmul.msk.bf16.gmra.mxu1 %vm69_vm0, %v717_v2 }
 0x178   :  { %1549 = vmatmul.msk.bf16.gmra.mxu2 %vm69_vm0, %v717_v2  ;;  %1557 = vmatmul.msk.bf16.gmra.mxu3 %vm69_vm0, %v717_v2  ;;  %vm1370_vm0 = vcmask 7168  }
 0x183   :  { %v879_v52 = vpop.f32.mrf.mxu0  ;;  %v928_v55 = vpop.f32.mrf.mxu1 }
 0x184   :  { %v1098_v48 = vmul.f32 1.442695, %v879_v52  ;;  %v1100_v33 = vmul.f32 1.442695, %v928_v55 }
 0x186   :  { %1628 = vpow2.f32 %v1098_v48 }
 0x187   :  { %1630 = vpow2.f32 %v1100_v33 }
 0x18a   :  { %v977_v39 = vpop.f32.mrf.mxu2  ;;  %v1026_v63 = vpop.f32.mrf.mxu3 }
 0x18b   :  { %v1102_v25 = vmul.f32 1.442695, %v977_v39  ;;  %v1104_v42 = vmul.f32 1.442695, %v1026_v63  ;;  %v881_v31 = vpop.f32.mrf.mxu0  ;;  %v930_v50 = vpop.f32.mrf.mxu1 }
 0x18c   :  { %v1106_v24 = vmul.f32 1.442695, %v881_v31  ;;  %v1108_v60 = vmul.f32 1.442695, %v930_v50  ;;  %v1629_v11 = vpop.eup %1628 }
 0x18d   :  { %1632 = vpow2.f32 %v1102_v25  ;;  %v1631_v47 = vpop.eup %1630 }
 0x18e   :  { %1634 = vpow2.f32 %v1104_v42  ;;  %v1226_v44 = vadd.f32 %v1631_v47, %v1629_v11 }
 0x18f   :  { %1636 = vpow2.f32 %v1106_v24 }
 0x190   :  { %1638 = vpow2.f32 %v1108_v60 }
 0x192   :  { %v979_v27 = vpop.f32.mrf.mxu2  ;;  %v1028_v22 = vpop.f32.mrf.mxu3 }
 0x193   :  { %v1633_v23 = vpop.eup %1632  ;;  %v1110_v17 = vmul.f32 1.442695, %v979_v27  ;;  %v1112_v16 = vmul.f32 1.442695, %v1028_v22  ;;  %v884_v3 = vpop.f32.mrf.mxu0 }
 0x194   :  { %v933_v54 = vpop.f32.mrf.mxu1  ;;  %v1114_v58 = vmul.f32 1.442695, %v884_v3  ;;  %v1227_v41 = vadd.f32 %v1633_v23, %v1226_v44  ;;  %v1635_v45 = vpop.eup %1634 }
 0x195   :  { %1640 = vpow2.f32 %v1110_v17  ;;  %v1116_v1 = vmul.f32 1.442695, %v933_v54  ;;  %v1637_v32 = vpop.eup %1636 }
 0x196   :  { %v1228_v59 = vadd.f32 %v1635_v45, %v1227_v41  ;;  %v1639_v18 = vpop.eup %1638  ;;  %1642 = vpow2.f32 %v1112_v16 }
 0x197   :  { %1644 = vpow2.f32 %v1114_v58  ;;  %v1231_v8 = vadd.f32 %v1639_v18, %v1637_v32 }
 0x198   :  { %1229 = vadd.xlane.f32.xlu2 %v1228_v59  ;;  %1646 = vpow2.f32 %v1116_v1 }
 0x19a   :  { %v982_v21 = vpop.f32.mrf.mxu2  ;;  %v1031_v62 = vpop.f32.mrf.mxu3 }
 0x19b   :  { %v1641_v53 = vpop.eup %1640  ;;  %v1118_v10 = vmul.f32 1.442695, %v982_v21  ;;  %v1120_v14 = vmul.f32 1.442695, %v1031_v62  ;;  %v886_v26 = vpop.f32.mrf.mxu0 }
 0x19c   :  { %v935_v30 = vpop.f32.mrf.mxu1  ;;  %v1122_v19 = vmul.f32 1.442695, %v886_v26  ;;  %v1232_v56 = vadd.f32 %v1641_v53, %v1231_v8  ;;  %v1643_v38 = vpop.eup %1642 }
 0x19d   :  { %1648 = vpow2.f32 %v1118_v10  ;;  %v1124_v51 = vmul.f32 1.442695, %v935_v30  ;;  %v1645_v61 = vpop.eup %1644 }
 0x19e   :  { %v1233_v34 = vadd.f32 %v1643_v38, %v1232_v56  ;;  %v1647_v6 = vpop.eup %1646  ;;  %1650 = vpow2.f32 %v1120_v14 }
 0x19f   :  { %1652 = vpow2.f32 %v1122_v19  ;;  %v1236_v7 = vadd.f32 %v1647_v6, %v1645_v61 }
 0x1a0   :  { %1234 = vadd.xlane.f32.xlu0 %v1233_v34  ;;  %1654 = vpow2.f32 %v1124_v51 }
 0x1a2   :  { %v984_v0 = vpop.f32.mrf.mxu2  ;;  %v1033_v9 = vpop.f32.mrf.mxu3 }
 0x1a3   :  { %v1649_v20 = vpop.eup %1648  ;;  %v1126_v49 = vmul.f32 1.442695, %v984_v0  ;;  %v1128_v40 = vmul.f32 1.442695, %v1033_v9  ;;  %v889_v43 = vpop.f32.mrf.mxu0 }
 0x1a4   :  { %v938_v15 = vpop.f32.mrf.mxu1  ;;  %v1130_v46 = vmul.f32 1.442695, %v889_v43  ;;  %v1237_v57 = vadd.f32 %v1649_v20, %v1236_v7  ;;  %v1651_v37 = vpop.eup %1650 }
 0x1a5   :  { %1656 = vpow2.f32 %v1126_v49  ;;  %v1132_v12 = vmul.f32 1.442695, %v938_v15  ;;  %v1653_v5 = vpop.eup %1652 }
 0x1a6   :  { %v1238_v35 = vadd.f32 %v1651_v37, %v1237_v57  ;;  %v1655_v13 = vpop.eup %1654  ;;  %1658 = vpow2.f32 %v1128_v40 }
 0x1a7   :  { %1660 = vpow2.f32 %v1130_v46  ;;  %v1241_v28 = vadd.f32 %v1655_v13, %v1653_v5 }
 0x1a8   :  { %1239 = vadd.xlane.f32.xlu2 %v1238_v35  ;;  %1662 = vpow2.f32 %v1132_v12 }
 0x1aa   :  { %v987_v4 = vpop.f32.mrf.mxu2  ;;  %v1036_v36 = vpop.f32.mrf.mxu3 }
 0x1ab   :  { %v1657_v29 = vpop.eup %1656  ;;  %v1134_v2 = vmul.f32 1.442695, %v987_v4  ;;  %v1136_v52 = vmul.f32 1.442695, %v1036_v36  ;;  %v891_v55 = vpop.f32.mrf.mxu0 }
 0x1ac   :  { %v940_v48 = vpop.f32.mrf.mxu1  ;;  %v1138_v33 = vmul.f32 1.442695, %v891_v55  ;;  %v1242_v39 = vadd.f32 %v1657_v29, %v1241_v28  ;;  %v1659_v63 = vpop.eup %1658 }
 0x1ad   :  { %1664 = vpow2.f32 %v1134_v2  ;;  %v1140_v25 = vmul.f32 1.442695, %v940_v48  ;;  %v1661_v42 = vpop.eup %1660 }
 0x1ae   :  { %v1243_v31 = vadd.f32 %v1659_v63, %v1242_v39  ;;  %v1663_v50 = vpop.eup %1662  ;;  %1666 = vpow2.f32 %v1136_v52 }
 0x1af   :  { %1668 = vpow2.f32 %v1138_v33  ;;  %v1246_v11 = vadd.f32 %v1663_v50, %v1661_v42 }
 0x1b0   :  { %1244 = vadd.xlane.f32.xlu1 %v1243_v31  ;;  %1670 = vpow2.f32 %v1140_v25 }
 0x1b2   :  { %v989_v24 = vpop.f32.mrf.mxu2  ;;  %v1038_v60 = vpop.f32.mrf.mxu3 }
 0x1b3   :  { %v1665_v47 = vpop.eup %1664  ;;  %v1142_v27 = vmul.f32 1.442695, %v989_v24  ;;  %v1144_v22 = vmul.f32 1.442695, %v1038_v60  ;;  %v894_v44 = vpop.f32.mrf.mxu0 }
 0x1b4   :  { %v943_v23 = vpop.f32.mrf.mxu1  ;;  %v1146_v17 = vmul.f32 1.442695, %v894_v44  ;;  %v1247_v16 = vadd.f32 %v1665_v47, %v1246_v11  ;;  %v1667_v3 = vpop.eup %1666 }
 0x1b5   :  { %1672 = vpow2.f32 %v1142_v27  ;;  %v1148_v54 = vmul.f32 1.442695, %v943_v23  ;;  %v1669_v58 = vpop.eup %1668 }
 0x1b6   :  { %v1248_v41 = vadd.f32 %v1667_v3, %v1247_v16  ;;  %v1671_v45 = vpop.eup %1670  ;;  %1674 = vpow2.f32 %v1144_v22 }
 0x1b7   :  { %1676 = vpow2.f32 %v1146_v17  ;;  %v1251_v59 = vadd.f32 %v1671_v45, %v1669_v58 }
 0x1b8   :  { %1249 = vadd.xlane.f32.xlu0 %v1248_v41  ;;  %1678 = vpow2.f32 %v1148_v54 }
 0x1ba   :  { %v992_v1 = vpop.f32.mrf.mxu2  ;;  %v1041_v32 = vpop.f32.mrf.mxu3 }
 0x1bb   :  { %v1673_v18 = vpop.eup %1672  ;;  %v1150_v21 = vmul.f32 1.442695, %v992_v1  ;;  %v1152_v62 = vmul.f32 1.442695, %v1041_v32  ;;  %v896_v8 = vpop.f32.mrf.mxu0 }
 0x1bc   :  { %v945_v53 = vpop.f32.mrf.mxu1  ;;  %v1154_v10 = vmul.f32 1.442695, %v896_v8  ;;  %v1252_v14 = vadd.f32 %v1673_v18, %v1251_v59  ;;  %v1675_v26 = vpop.eup %1674 }
 0x1bd   :  { %1680 = vpow2.f32 %v1150_v21  ;;  %v1156_v30 = vmul.f32 1.442695, %v945_v53  ;;  %v1677_v19 = vpop.eup %1676 }
 0x1be   :  { %v1253_v56 = vadd.f32 %v1675_v26, %v1252_v14  ;;  %v1679_v38 = vpop.eup %1678  ;;  %1682 = vpow2.f32 %v1152_v62 }
 0x1bf   :  { %1684 = vpow2.f32 %v1154_v10  ;;  %v1256_v34 = vadd.f32 %v1679_v38, %v1677_v19 }
 0x1c0   :  { %1254 = vadd.xlane.f32.xlu2 %v1253_v56  ;;  %1686 = vpow2.f32 %v1156_v30 }
 0x1c2   :  { %v994_v51 = vpop.f32.mrf.mxu2  ;;  %v1043_v61 = vpop.f32.mrf.mxu3 }
 0x1c3   :  { %v1681_v6 = vpop.eup %1680  ;;  %v1158_v0 = vmul.f32 1.442695, %v994_v51  ;;  %v1160_v9 = vmul.f32 1.442695, %v1043_v61 }
 0x1c4   :  { %v899_v7 = vpop.f32.mrf.mxu0  ;;  %v948_v20 = vpop.f32.mrf.mxu1  ;;  %v1257_v40 = vadd.f32 %v1681_v6, %v1256_v34 }
 0x1c5   :  { %v1162_v49 = vmul.f32 1.442695, %v899_v7  ;;  %v1683_v43 = vpop.eup %1682  ;;  %1688 = vpow2.f32 %v1158_v0  ;;  %v1164_v15 = vmul.f32 1.442695, %v948_v20 }
 0x1c6   :  { %v1685_v46 = vpop.eup %1684  ;;  %v1258_v57 = vadd.f32 %v1683_v43, %v1257_v40  ;;  %1690 = vpow2.f32 %v1160_v9 }
 0x1c7   :  { %v1687_v37 = vpop.eup %1686  ;;  %1692 = vpow2.f32 %v1162_v49 }
 0x1c8   :  { %1259 = vadd.xlane.f32.xlu1 %v1258_v57  ;;  %1694 = vpow2.f32 %v1164_v15  ;;  %v1261_v35 = vadd.f32 %v1687_v37, %v1685_v46 }
 0x1cb   :  { %v997_v12 = vpop.f32.mrf.mxu2  ;;  %v1046_v5 = vpop.f32.mrf.mxu3 }
 0x1cc   :  { %v1689_v13 = vpop.eup %1688  ;;  %v1166_v4 = vmul.f32 1.442695, %v997_v12  ;;  %v1168_v36 = vmul.f32 1.442695, %v1046_v5  ;;  %v901_v28 = vpop.f32.mrf.mxu0 }
 0x1cd   :  { %v950_v29 = vpop.f32.mrf.mxu1  ;;  %v1170_v2 = vmul.f32 1.442695, %v901_v28  ;;  %v1262_v52 = vadd.f32 %v1689_v13, %v1261_v35  ;;  %v1691_v55 = vpop.eup %1690 }
 0x1ce   :  { %1696 = vpow2.f32 %v1166_v4  ;;  %v1172_v48 = vmul.f32 1.442695, %v950_v29  ;;  %v1693_v33 = vpop.eup %1692 }
 0x1cf   :  { %v1263_v39 = vadd.f32 %v1691_v55, %v1262_v52  ;;  %v1695_v63 = vpop.eup %1694  ;;  %1698 = vpow2.f32 %v1168_v36 }
 0x1d0   :  { %1700 = vpow2.f32 %v1170_v2  ;;  %v1266_v31 = vadd.f32 %v1695_v63, %v1693_v33 }
 0x1d1   :  { %1264 = vadd.xlane.f32.xlu0 %v1263_v39  ;;  %1702 = vpow2.f32 %v1172_v48 }
 0x1d3   :  { %v999_v25 = vpop.f32.mrf.mxu2  ;;  %v1048_v42 = vpop.f32.mrf.mxu3 }
 0x1d4   :  { %v1697_v50 = vpop.eup %1696  ;;  %v1174_v24 = vmul.f32 1.442695, %v999_v25  ;;  %v1176_v60 = vmul.f32 1.442695, %v1048_v42  ;;  %v904_v11 = vpop.f32.mrf.mxu0 }
 0x1d5   :  { %v953_v47 = vpop.f32.mrf.mxu1  ;;  %v1178_v27 = vmul.f32 1.442695, %v904_v11  ;;  %v1267_v22 = vadd.f32 %v1697_v50, %v1266_v31  ;;  %v1699_v44 = vpop.eup %1698 }
 0x1d6   :  { %1704 = vpow2.f32 %v1174_v24  ;;  %v1180_v23 = vmul.f32 1.442695, %v953_v47  ;;  %v1701_v17 = vpop.eup %1700 }
 0x1d7   :  { %v1268_v16 = vadd.f32 %v1699_v44, %v1267_v22  ;;  %v1703_v3 = vpop.eup %1702  ;;  %1706 = vpow2.f32 %v1176_v60 }
 0x1d8   :  { %1708 = vpow2.f32 %v1178_v27  ;;  %v1271_v41 = vadd.f32 %v1703_v3, %v1701_v17 }
 0x1d9   :  { %1269 = vadd.xlane.f32.xlu2 %v1268_v16  ;;  %1710 = vpow2.f32 %v1180_v23 }
 0x1db   :  { %v1002_v54 = vpop.f32.mrf.mxu2  ;;  %v1051_v58 = vpop.f32.mrf.mxu3 }
 0x1dc   :  { %v1705_v45 = vpop.eup %1704  ;;  %v1182_v1 = vmul.f32 1.442695, %v1002_v54  ;;  %v1184_v32 = vmul.f32 1.442695, %v1051_v58  ;;  %v906_v59 = vpop.f32.mrf.mxu0 }
 0x1dd   :  { %v955_v18 = vpop.f32.mrf.mxu1  ;;  %v1186_v21 = vmul.f32 1.442695, %v906_v59  ;;  %v1272_v62 = vadd.f32 %v1705_v45, %v1271_v41  ;;  %v1707_v8 = vpop.eup %1706 }
 0x1de   :  { %1712 = vpow2.f32 %v1182_v1  ;;  %v1188_v53 = vmul.f32 1.442695, %v955_v18  ;;  %v1709_v10 = vpop.eup %1708 }
 0x1df   :  { %v1273_v14 = vadd.f32 %v1707_v8, %v1272_v62  ;;  %v1711_v26 = vpop.eup %1710  ;;  %1714 = vpow2.f32 %v1184_v32 }
 0x1e0   :  { %1716 = vpow2.f32 %v1186_v21  ;;  %v1276_v56 = vadd.f32 %v1711_v26, %v1709_v10 }
 0x1e1   :  { %1274 = vadd.xlane.f32.xlu1 %v1273_v14  ;;  %1718 = vpow2.f32 %v1188_v53 }
 0x1e3   :  { %v1004_v30 = vpop.f32.mrf.mxu2  ;;  %v1053_v19 = vpop.f32.mrf.mxu3 }
 0x1e4   :  { %v1713_v38 = vpop.eup %1712  ;;  %v1190_v51 = vmul.f32 1.442695, %v1004_v30  ;;  %v1192_v61 = vmul.f32 1.442695, %v1053_v19  ;;  %v909_v34 = vpop.f32.mrf.mxu0 }
 0x1e5   :  { %v958_v6 = vpop.f32.mrf.mxu1  ;;  %v1194_v0 = vmul.f32 1.442695, %v909_v34  ;;  %v1277_v9 = vadd.f32 %v1713_v38, %v1276_v56  ;;  %v1715_v7 = vpop.eup %1714 }
 0x1e6   :  { %1720 = vpow2.f32 %v1190_v51  ;;  %v1196_v20 = vmul.f32 1.442695, %v958_v6  ;;  %v1717_v49 = vpop.eup %1716 }
 0x1e7   :  { %v1278_v40 = vadd.f32 %v1715_v7, %v1277_v9  ;;  %v1719_v43 = vpop.eup %1718  ;;  %1722 = vpow2.f32 %v1192_v61 }
 0x1e8   :  { %1724 = vpow2.f32 %v1194_v0  ;;  %v1281_v57 = vadd.f32 %v1719_v43, %v1717_v49  ;;  %v3468_v49 = vpop.xlane.xlu2 %599  ;;  %v3472_v43 = vpop.xlane.xlu1 %605 }
 0x1e9   :  { %1279 = vadd.xlane.f32.xlu0 %v1278_v40  ;;  %1726 = vpow2.f32 %v1196_v20  ;;  %v3470_v40 = vpop.xlane.xlu0 %602 }
 0x1eb   :  { %v1007_v15 = vpop.f32.mrf.mxu2  ;;  %v1056_v46 = vpop.f32.mrf.mxu3 }
 0x1ec   :  { %v1721_v37 = vpop.eup %1720  ;;  %v1198_v12 = vmul.f32 1.442695, %v1007_v15  ;;  %v1200_v5 = vmul.f32 1.442695, %v1056_v46  ;;  %v911_v35 = vpop.f32.mrf.mxu0 }
 0x1ed   :  { %v960_v13 = vpop.f32.mrf.mxu1  ;;  %v1202_v4 = vmul.f32 1.442695, %v911_v35  ;;  %v1282_v36 = vadd.f32 %v1721_v37, %v1281_v57  ;;  %v1723_v28 = vpop.eup %1722 }
 0x1ee   :  { %1728 = vpow2.f32 %v1198_v12  ;;  %v1204_v29 = vmul.f32 1.442695, %v960_v13  ;;  %v1725_v2 = vpop.eup %1724 }
 0x1ef   :  { %v1283_v52 = vadd.f32 %v1723_v28, %v1282_v36  ;;  %v1727_v55 = vpop.eup %1726  ;;  %1730 = vpow2.f32 %v1200_v5 }
 0x1f0   :  { %1732 = vpow2.f32 %v1202_v4  ;;  %v1286_v39 = vadd.f32 %v1727_v55, %v1725_v2  ;;  %v3474_v15 = vpop.xlane.xlu2 %608  ;;  %v3478_v57 = vpop.xlane.xlu1 %614  ;;  %v1068_v55 = vmul.f32 1.442695, %v3470_v40 }
 0x1f1   :  { %1284 = vadd.xlane.f32.xlu2 %v1283_v52  ;;  %1734 = vpow2.f32 %v1204_v29  ;;  %v3476_v46 = vpop.xlane.xlu0 %611 }
 0x1f3   :  { %v1009_v48 = vpop.f32.mrf.mxu2  ;;  %v1058_v33 = vpop.f32.mrf.mxu3 }
 0x1f4   :  { %v1729_v63 = vpop.eup %1728  ;;  %v1206_v25 = vmul.f32 1.442695, %v1009_v48  ;;  %v1208_v42 = vmul.f32 1.442695, %v1058_v33  ;;  %v914_v31 = vpop.f32.mrf.mxu0  ;;  %v1066_v33 = vmul.f32 1.442695, %v3468_v49 }
 0x1f5   :  { %v963_v50 = vpop.f32.mrf.mxu1  ;;  %v1210_v24 = vmul.f32 1.442695, %v914_v31  ;;  %v1287_v60 = vadd.f32 %v1729_v63, %v1286_v39  ;;  %v1731_v11 = vpop.eup %1730  ;;  %v1070_v39 = vmul.f32 1.442695, %v3472_v43  ;;  %v1072_v63 = vmul.f32 1.442695, %v3474_v15 }
 0x1f6   :  { %1736 = vpow2.f32 %v1206_v25  ;;  %v1212_v47 = vmul.f32 1.442695, %v963_v50  ;;  %v1733_v27 = vpop.eup %1732  ;;  %v1076_v50 = vmul.f32 1.442695, %v3478_v57 }
 0x1f7   :  { %v1288_v22 = vadd.f32 %v1731_v11, %v1287_v60  ;;  %v1735_v44 = vpop.eup %1734  ;;  %1738 = vpow2.f32 %v1208_v42  ;;  %v1074_v42 = vmul.f32 1.442695, %v3476_v46 }
 0x1f8   :  { %1740 = vpow2.f32 %v1210_v24  ;;  %v1291_v16 = vadd.f32 %v1735_v44, %v1733_v27  ;;  %v3480_v37 = vpop.xlane.xlu2 %623  ;;  %v3484_v5 = vpop.xlane.xlu1 %617 }
 0x1f9   :  { %1289 = vadd.xlane.f32.xlu0 %v1288_v22  ;;  %1742 = vpow2.f32 %v1212_v47  ;;  %v3482_v12 = vpop.xlane.xlu0 %620  ;;  %v1078_v47 = vmul.f32 1.442695, %v3484_v5 }
 0x1fa   :  { %v1080_v60 = vmul.f32 1.442695, %v3482_v12 }
 0x1fb   :  { %v1012_v23 = vpop.f32.mrf.mxu2  ;;  %v1061_v17 = vpop.f32.mrf.mxu3 }
 0x1fc   :  { %v1737_v3 = vpop.eup %1736  ;;  %v1214_v54 = vmul.f32 1.442695, %v1012_v23  ;;  %v1216_v58 = vmul.f32 1.442695, %v1061_v17  ;;  %v916_v41 = vpop.f32.mrf.mxu0 }
 0x1fd   :  { %v965_v45 = vpop.f32.mrf.mxu1  ;;  %v1218_v1 = vmul.f32 1.442695, %v916_v41  ;;  %v1292_v32 = vadd.f32 %v1737_v3, %v1291_v16  ;;  %v1739_v59 = vpop.eup %1738 }
 0x1fe   :  { %1744 = vpow2.f32 %v1214_v54  ;;  %v1220_v18 = vmul.f32 1.442695, %v965_v45  ;;  %v1741_v21 = vpop.eup %1740  ;;  %v1082_v54 = vmul.f32 1.442695, %v3480_v37 }
 0x1ff   :  { %v1293_v62 = vadd.f32 %v1739_v59, %v1292_v32  ;;  %v1743_v8 = vpop.eup %1742  ;;  %1746 = vpow2.f32 %v1216_v58 }
 0x200   :  { %1748 = vpow2.f32 %v1218_v1  ;;  %v1296_v14 = vadd.f32 %v1743_v8, %v1741_v21  ;;  %v3486_v35 = vpop.xlane.xlu2 %632  ;;  %v3490_v4 = vpop.xlane.xlu1 %626 }
 0x201   :  { %1294 = vadd.xlane.f32.xlu1 %v1293_v62  ;;  %1750 = vpow2.f32 %v1220_v18  ;;  %v3488_v13 = vpop.xlane.xlu0 %629  ;;  %v1084_v1 = vmul.f32 1.442695, %v3490_v4 }
 0x202   :  { %v1086_v21 = vmul.f32 1.442695, %v3488_v13 }
 0x203   :  { %v1014_v53 = vpop.f32.mrf.mxu2  ;;  %v1063_v10 = vpop.f32.mrf.mxu3 }
 0x204   :  { %v1745_v26 = vpop.eup %1744  ;;  %v1222_v30 = vmul.f32 1.442695, %v1014_v53  ;;  %v1224_v19 = vmul.f32 1.442695, %v1063_v10  ;;  %v1088_v10 = vmul.f32 1.442695, %v3486_v35 }
 0x205   :  { %v1297_v56 = vadd.f32 %v1745_v26, %v1296_v14  ;;  %v1747_v38 = vpop.eup %1746 }
 0x206   :  { %1752 = vpow2.f32 %v1222_v30  ;;  %v1749_v51 = vpop.eup %1748 }
 0x207   :  { %v1298_v61 = vadd.f32 %v1747_v38, %v1297_v56  ;;  %v1751_v34 = vpop.eup %1750  ;;  %1754 = vpow2.f32 %v1224_v19 }
 0x208   :  { %v1301_v6 = vadd.f32 %v1751_v34, %v1749_v51  ;;  %v3492_v36 = vpop.xlane.xlu2 %641  ;;  %v3496_v29 = vpop.xlane.xlu1 %635  ;;  %1756 = vpow2.f32 %v1068_v55 }
 0x209   :  { %1299 = vadd.xlane.f32.xlu2 %v1298_v61  ;;  %v3494_v28 = vpop.xlane.xlu0 %638  ;;  %1758 = vpow2.f32 %v1066_v33  ;;  %v1090_v56 = vmul.f32 1.442695, %v3496_v29 }
 0x20a   :  { %1760 = vpow2.f32 %v1070_v39 }
 0x20b   :  { %1762 = vpow2.f32 %v1072_v63 }
 0x20c   :  { %v1753_v0 = vpop.eup %1752  ;;  %1764 = vpow2.f32 %v1074_v42 }
 0x20d   :  { %v1302_v9 = vadd.f32 %v1753_v0, %v1301_v6  ;;  %v1755_v7 = vpop.eup %1754  ;;  %1766 = vpow2.f32 %v1076_v50  ;;  %v1092_v6 = vmul.f32 1.442695, %v3494_v28 }
 0x20e   :  { %v1757_v11 = vpop.eup %1756  ;;  %1768 = vpow2.f32 %v1080_v60 }
 0x20f   :  { %v1303_v20 = vadd.f32 %v1755_v7, %v1302_v9  ;;  %v1759_v27 = vpop.eup %1758  ;;  %1770 = vpow2.f32 %v1078_v47 }
 0x210   :  { %v1230_v2 = vpop.xlane.xlu2 %1229  ;;  %v3499_v48 = vpop.xlane.xlu1 %644 }
 0x211   :  { %1304 = vadd.xlane.f32.xlu0 %v1303_v20  ;;  %v1761_v44 = vpop.eup %1760  ;;  %v1306_v23 = vadd.f32 %v1759_v27, %v1230_v2 }
 0x212   :  { %v1763_v3 = vpop.eup %1762 }
 0x213   :  { %v1235_v52 = vpop.xlane.xlu0 %1234  ;;  %v1765_v45 = vpop.eup %1764 }
 0x214   :  { %v1307_v22 = vadd.f32 %v1757_v11, %v1235_v52  ;;  %v1767_v18 = vpop.eup %1766 }
 0x215   :  { %v1769_v62 = vpop.eup %1768 }
 0x216   :  { %1772 = vlog2.f32 %v1307_v22  ;;  %v1771_v53 = vpop.eup %1770 }
 0x217   :  { %1774 = vlog2.f32 %v1306_v23 }
 0x21b   :  { %v1240_v25 = vpop.xlane.xlu2 %1239 }
 0x21c   :  { %v1308_v16 = vadd.f32 %v1761_v44, %v1240_v25  ;;  %v1773_v26 = vpop.eup %1772  ;;  %v1094_v25 = vmul.f32 1.442695, %v3492_v36 }
 0x21d   :  { %v1775_v19 = vpop.eup %1774  ;;  %v1325_v0 = vmul.f32 0.6931472, %v1773_v26 }
 0x21e   :  { %1776 = vlog2.f32 %v1308_v16  ;;  %v1323_v52 = vmul.f32 0.6931472, %v1775_v19 }
 0x21f   :  { %1778 = vpow2.f32 %v1082_v54  ;;  %v1355_v42 = vsub.f32 %v1325_v0, %v3470_v40 }
 0x220   :  { %v1354_v47 = vsub.f32 %v1323_v52, %v3468_v49 }
 0x221   :  { %v1372_v40 = vsel %vm1370_vm0, %v1355_v42, 0.0 }
 0x223   :  { %v1245_v24 = vpop.xlane.xlu1 %1244 }
 0x224   :  { %v1309_v41 = vadd.f32 %v1763_v3, %v1245_v24  ;;  %v1777_v51 = vpop.eup %1776 }
 0x225   :  { %v1779_v34 = vpop.eup %1778  ;;  %v1327_v55 = vmul.f32 0.6931472, %v1777_v51 }
 0x226   :  { %1780 = vlog2.f32 %v1309_v41 }
 0x227   :  { %1782 = vpow2.f32 %v1084_v1  ;;  %v1356_v27 = vsub.f32 %v1327_v55, %v3472_v43  ;;  %v1371_v43 = vsel %vm1370_vm0, %v1354_v47, 0.0 }
 0x229   :  { %v1374_v1 = vsel %vm1370_vm0, %v1356_v27, 0.0 }
 0x22b   :  { %v1250_v31 = vpop.xlane.xlu0 %1249 }
 0x22c   :  { %v1310_v59 = vadd.f32 %v1765_v45, %v1250_v31  ;;  %v1781_v7 = vpop.eup %1780 }
 0x22d   :  { %v1783_v2 = vpop.eup %1782  ;;  %v1329_v31 = vmul.f32 0.6931472, %v1781_v7 }
 0x22e   :  { %1784 = vlog2.f32 %v1310_v59 }
 0x22f   :  { %1786 = vpow2.f32 %v1086_v21  ;;  %v1357_v3 = vsub.f32 %v1329_v31, %v3474_v15  ;;  %v1373_v21 = vadd.f32 %v1372_v40, %v1371_v43 }
 0x233   :  { %v1255_v17 = vpop.xlane.xlu2 %1254 }
 0x234   :  { %v1311_v8 = vadd.f32 %v1767_v18, %v1255_v17  ;;  %v1785_v33 = vpop.eup %1784 }
 0x235   :  { %v1787_v63 = vpop.eup %1786  ;;  %v1331_v22 = vmul.f32 0.6931472, %v1785_v33 }
 0x236   :  { %1788 = vlog2.f32 %v1311_v8  ;;  %v1376_v8 = vsel %vm1370_vm0, %v1357_v3, 0.0 }
 0x237   :  { %1790 = vpow2.f32 %v1088_v10 }
 0x23b   :  { %v1260_v32 = vpop.xlane.xlu1 %1259 }
 0x23c   :  { %v1312_v30 = vadd.f32 %v1771_v53, %v1260_v32  ;;  %v1789_v24 = vpop.eup %1788  ;;  %v1358_v32 = vsub.f32 %v1331_v22, %v3476_v46 }
 0x23d   :  { %v1791_v11 = vpop.eup %1790  ;;  %v1333_v54 = vmul.f32 0.6931472, %v1789_v24 }
 0x23e   :  { %1792 = vlog2.f32 %v1312_v30  ;;  %v1096_v30 = vmul.f32 1.442695, %v3499_v48  ;;  %v1378_v19 = vsel %vm1370_vm0, %v1358_v32, 0.0 }
 0x23f   :  { %1794 = vpow2.f32 %v1090_v56  ;;  %v1359_v15 = vsub.f32 %v1333_v54, %v3478_v57 }
 0x244   :  { %v1265_v58 = vpop.xlane.xlu0 %1264  ;;  %v1793_v23 = vpop.eup %1792 }
 0x245   :  { %v1313_v61 = vadd.f32 %v1769_v62, %v1265_v58  ;;  %v1795_v16 = vpop.eup %1794  ;;  %v1335_v59 = vmul.f32 0.6931472, %v1793_v23 }
 0x247   :  { %1796 = vlog2.f32 %v1313_v61  ;;  %v1360_v46 = vsub.f32 %v1335_v59, %v3484_v5  ;;  %v1380_v61 = vsel %vm1370_vm0, %v1359_v15, 0.0 }
 0x248   :  { %1798 = vpow2.f32 %v1092_v6 }
 0x24c   :  { %v1270_v14 = vpop.xlane.xlu2 %1269 }
 0x24d   :  { %v1314_v20 = vadd.f32 %v1779_v34, %v1270_v14  ;;  %v1797_v41 = vpop.eup %1796  ;;  %v1375_v14 = vadd.f32 %v1374_v1, %v1373_v21 }
 0x24e   :  { %v1799_v49 = vpop.eup %1798  ;;  %v1337_v53 = vmul.f32 0.6931472, %v1797_v41 }
 0x24f   :  { %1800 = vlog2.f32 %v1314_v20  ;;  %v1377_v51 = vadd.f32 %v1376_v8, %v1375_v14  ;;  %v1382_v20 = vsel %vm1370_vm0, %v1360_v46, 0.0 }
 0x250   :  { %v1361_v34 = vsub.f32 %v1337_v53, %v3482_v12 }
 0x252   :  { %v1384_v33 = vsel %vm1370_vm0, %v1361_v34, 0.0 }
 0x254   :  { %v1275_v9 = vpop.xlane.xlu1 %1274 }
 0x255   :  { %v1315_v39 = vadd.f32 %v1783_v2, %v1275_v9  ;;  %v1801_v18 = vpop.eup %1800  ;;  %v1379_v9 = vadd.f32 %v1378_v19, %v1377_v51 }
 0x256   :  { %v1339_v56 = vmul.f32 0.6931472, %v1801_v18 }
 0x257   :  { %1802 = vlog2.f32 %v1315_v39  ;;  %v1381_v55 = vadd.f32 %v1380_v61, %v1379_v9 }
 0x258   :  { %1804 = vpow2.f32 %v1094_v25  ;;  %v1362_v2 = vsub.f32 %v1339_v56, %v3480_v37 }
 0x259   :  { %v1383_v25 = vadd.f32 %v1382_v20, %v1381_v55 }
 0x25a   :  { %v1386_v42 = vsel %vm1370_vm0, %v1362_v2, 0.0 }
 0x25b   :  { %v1385_v24 = vadd.f32 %v1384_v33, %v1383_v25 }
 0x25c   :  { %v1280_v38 = vpop.xlane.xlu0 %1279 }
 0x25d   :  { %v1316_v60 = vadd.f32 %v1787_v63, %v1280_v38  ;;  %v1803_v10 = vpop.eup %1802 }
 0x25e   :  { %v1805_v26 = vpop.eup %1804  ;;  %v1341_v57 = vmul.f32 0.6931472, %v1803_v10 }
 0x25f   :  { %1806 = vlog2.f32 %v1316_v60 }
 0x260   :  { %v1363_v39 = vsub.f32 %v1341_v57, %v3490_v4 }
 0x262   :  { %v1388_v37 = vsel %vm1370_vm0, %v1363_v39, 0.0 }
 0x264   :  { %v1285_v50 = vpop.xlane.xlu2 %1284 }
 0x265   :  { %v1317_v17 = vadd.f32 %v1791_v11, %v1285_v50  ;;  %v1807_v38 = vpop.eup %1806 }
 0x266   :  { %v1343_v52 = vmul.f32 0.6931472, %v1807_v38 }
 0x267   :  { %1808 = vlog2.f32 %v1317_v17 }
 0x268   :  { %v1364_v31 = vsub.f32 %v1343_v52, %v3488_v13 }
 0x26a   :  { %v1390_v4 = vsel %vm1370_vm0, %v1364_v31, 0.0 }
 0x26c   :  { %v1290_v44 = vpop.xlane.xlu0 %1289 }
 0x26d   :  { %v1318_v45 = vadd.f32 %v1795_v16, %v1290_v44  ;;  %v1809_v0 = vpop.eup %1808  ;;  %v1387_v44 = vadd.f32 %v1386_v42, %v1385_v24 }
 0x26e   :  { %v1345_v63 = vmul.f32 0.6931472, %v1809_v0 }
 0x26f   :  { %1810 = vlog2.f32 %v1318_v45  ;;  %v1389_v40 = vadd.f32 %v1388_v37, %v1387_v44 }
 0x270   :  { %v1365_v11 = vsub.f32 %v1345_v63, %v3486_v35 }
 0x271   :  { %v1391_v54 = vadd.f32 %v1390_v4, %v1389_v40 }
 0x272   :  { %v1392_v13 = vsel %vm1370_vm0, %v1365_v11, 0.0 }
 0x273   :  { %v1393_v41 = vadd.f32 %v1392_v13, %v1391_v54 }
 0x274   :  { %v1295_v58 = vpop.xlane.xlu1 %1294 }
 0x275   :  { %v1319_v62 = vadd.f32 %v1799_v49, %v1295_v58  ;;  %v1811_v5 = vpop.eup %1810 }
 0x276   :  { %v1347_v50 = vmul.f32 0.6931472, %v1811_v5 }
 0x277   :  { %1812 = vlog2.f32 %v1319_v62  ;;  %v1874_v62 = vmov 128.0  }
 0x278   :  { %1814 = vpow2.f32 %v1096_v30  ;;  %v1366_v17 = vsub.f32 %v1347_v50, %v3496_v29 }
 0x27a   :  { %v1394_v58 = vsel %vm1370_vm0, %v1366_v17, 0.0 }
 0x27b   :  { %v1395_v43 = vadd.f32 %v1394_v58, %v1393_v41 }
 0x27c   :  { %v1300_v6 = vpop.xlane.xlu2 %1299 }
 0x27d   :  { %v1320_v7 = vadd.f32 %v1805_v26, %v1300_v6  ;;  %v1813_v12 = vpop.eup %1812 }
 0x27e   :  { %v1815_v60 = vpop.eup %1814  ;;  %v1349_v47 = vmul.f32 0.6931472, %v1813_v12 }
 0x27f   :  { %1816 = vlog2.f32 %v1320_v7 }
 0x280   :  { %v1367_v3 = vsub.f32 %v1349_v47, %v3494_v28 }
 0x282   :  { %v1396_v45 = vsel %vm1370_vm0, %v1367_v3, 0.0 }
 0x283   :  { %v1397_v32 = vadd.f32 %v1396_v45, %v1395_v43 }
 0x284   :  { %v1305_v27 = vpop.xlane.xlu0 %1304 }
 0x285   :  { %v1817_v22 = vpop.eup %1816  ;;  %v1321_v23 = vadd.f32 %v1815_v60, %v1305_v27 }
 0x286   :  { %v1351_v16 = vmul.f32 0.6931472, %v1817_v22 }
 0x287   :  { %1818 = vlog2.f32 %v1321_v23 }
 0x288   :  { %v1368_v35 = vsub.f32 %v1351_v16, %v3492_v36  ;;  %1820 = vrcp.f32 %v1874_v62 }
 0x28a   :  { %v1398_v29 = vsel %vm1370_vm0, %v1368_v35, 0.0 }
 0x28b   :  { %v1399_v18 = vadd.f32 %v1398_v29, %v1397_v32 }
 0x28d   :  { %v1819_v49 = vpop.eup %1818 }
 0x28e   :  { %v1353_v1 = vmul.f32 0.6931472, %v1819_v49  ;;  %v1821_v8 = vpop.eup %1820 }
 0x28f   :  { %v1412_v36 = vmul.f32 128.0, %v1821_v8  ;;  %vm1416_vm4 = vweird.f32 %v1821_v8 }
 0x290   :  { %v1369_v59 = vsub.f32 %v1353_v1, %v3499_v48 }
 0x291   :  { %v1413_v15 = vsub.f32 1.0, %v1412_v36 }
 0x292   :  { %v1400_v21 = vsel %vm1370_vm0, %v1369_v59, 0.0 }
 0x293   :  { %v1401_v28 = vadd.f32 %v1400_v21, %v1399_v18  ;;  %v1414_v26 = vmul.f32 %v1821_v8, %v1413_v15 }
 0x295   :  { %1402 = vadd.xlane.f32.xlu1 %v1401_v28  ;;  %v1415_v46 = vadd.f32 %v1821_v8, %v1414_v26 }
 0x297   :  { %v1417_v38 = vsel %vm1416_vm4, %v1821_v8, %v1415_v46 }
 0x308   :  { %v1403_v53 = vpop.xlane.xlu1 %1402 }
 0x309   :  { %v1404_v10 = vrot.slane %v1403_v53, 4 }
 0x30b   :  { %v1405_v14 = vadd.f32 %v1404_v10, %v1403_v53 }
 0x30d   :  { %v1406_v30 = vrot.slane %v1405_v14, 2 }
 0x30f   :  { %v1407_v19 = vadd.f32 %v1406_v30, %v1405_v14 }
 0x311   :  { %v1408_v56 = vrot.slane %v1407_v19, 1 }
 0x313   :  { %v1409_v48 = vadd.f32 %v1408_v56, %v1407_v19 }
 0x315   :  { %1558 = vpush %v1409_v48 }
 0x316   :  { %1560 = vpush %v1417_v38 }
 0x346   :  { %s1559_s14 = spop %1558 }
 0x347   :  { %s1561_s17 = spop %1560 }
 0x348   :  { %s1419_s18 = smul.f32 %s1561_s17, %s1559_s14 }
 0x34a   :  { %v1420_v51 = vstv %s1419_s18 }
 0x34b   :  { %1422 = vst.msk [vmem:[#allocation3] sm:$0x1] %vm1421_vm14, %v1420_v51 }
 0x34c   :  { %1515 = dma.vmem_to_hbm [thread:$0]  %s1511_s16, 16, %s1513_s13, [#allocation4]  }
 0x34d   :  { %1872 = dma.done.wait [#allocation4], 16  }
 0x34e   :  { %1873 = vsyncadd [#allocation4], 4294967280 }
 0x34f   :  { %1524 = vsyncpa [#allocation4], 1 }

</bundles_post_ra>
